<compile_context>
chip_gen: v6e
topology: v6e:2x2x1
jax: 0.10.0
libtpu: 0.0.40
codegen_flags: <defaults>
</compile_context>

<pallas_src>
import functools

import jax
import jax.numpy as jnp
from jax.experimental import pallas as pl
from jax.experimental.pallas import tpu as pltpu


def _tree_sum(parts):
    """Balanced-tree sum of a list of equal-shaped arrays (log2 dependency depth)."""
    parts = list(parts)
    while len(parts) > 1:
        nxt = [parts[i] + parts[i + 1] for i in range(0, len(parts) - 1, 2)]
        if len(parts) % 2:
            nxt.append(parts[-1])
        parts = nxt
    return parts[0]


def lstm_classifier_kernel(x_ref, wih_ref, whh_ref, b_ref, wd_ref, bd_ref,
                           out_ref, *, batch, seq_len):
    """Full LSTM recurrence + dense head + sigmoid in one kernel invocation.

    x_ref  : (T*B, D)  time-major flattened input (row t*B + b == x[b, t])
    wih_ref: (D, 4H)   input->gates weights, columns in packed order i|f|o|g
    whh_ref: (H, 4H)   hidden->gates weights, same column order
    b_ref  : (1, 4H)   combined bias b_ih + b_hh, same column order
    wd_ref : (1, H)    dense weight as a row (VPU mul + lane reduce, no MXU)
    bd_ref : (1, 1)    dense bias
    out_ref: (B, 1)    sigmoid(logits)
    """
    _, D = x_ref.shape
    H = whh_ref.shape[0]
    H3 = 3 * H

    x = x_ref[...]                 # (T*B, D) f32
    wih = wih_ref[...]             # (D, 4H)  f32
    whh = whh_ref[...]             # (H, 4H)  f32, VMEM/vreg-resident across the loop

    # ---- Hoisted input projection + bias (pure VPU, off the serial path) -----
    # gates_x[r] = x[r] @ Wih + (b_ih + b_hh), for all T*B rows at once.
    gates_x = b_ref[...] + _tree_sum(
        [x[:, d:d + 1] * wih[d:d + 1, :] for d in range(D)])   # (T*B, 4H)

    h = jnp.zeros((batch, H), jnp.float32)
    c = jnp.zeros((batch, H), jnp.float32)

    # ---- Recurrence: fully unrolled static loop (T is a small static count) --
    for t in range(seq_len):
        gx_t = gates_x[t * batch:(t + 1) * batch, :]            # static sublane slice
        if t == 0:
            gates = gx_t                                        # h == 0 at t == 0
        else:
            # h @ Whh on the VPU: H independent broadcast multiply-adds,
            # balanced add tree (depth log2 H) instead of an MXU round-trip.
            gates = gx_t + _tree_sum(
                [h[:, k:k + 1] * whh[k:k + 1, :] for k in range(H)])

        # Packed activations: gate column layout is [i | f | o | g].
        sig = jax.nn.sigmoid(gates[:, :H3])     # one EUP pass covers i, f, o
        g_g = jnp.tanh(gates[:, H3:])           # one EUP pass for g
        i_g = sig[:, 0:H]
        f_g = sig[:, H:2 * H]
        o_g = sig[:, 2 * H:H3]
        # TODO(synk): if H grows to >=128, pad each gate block to a 128-lane
        # boundary host-side so these slices stay whole-vreg (no masked selects).
        c = f_g * c + i_g * g_g                 # state kept in f32
        h = o_g * jnp.tanh(c)

    # ---- Dense head on VPU/XLU: (B,H)*(1,H) -> lane reduce -> (B,1) ----------
    logits = jnp.sum(h * wd_ref[...], axis=-1, keepdims=True) + bd_ref[...]
    out_ref[...] = jax.nn.sigmoid(logits)


def lstm_classifier_forward(x, w_ih, w_hh, b_ih, b_hh, w_dense, b_dense):
    """x: (B, T, D) float32, batch_first like PyTorch.  Returns (B, 1)."""
    B, T, D = x.shape
    H = w_hh.shape[1]              # w_hh: (4H, H), PyTorch gate order i, f, g, o

    # --- One-time XLA-side weight prep (tiny, off the kernel) -----------------
    # Permute gate blocks (i, f, g, o) -> (i, f, o, g) so the kernel can run one
    # packed sigmoid over the first 3H columns and one tanh over the last H.
    perm = jnp.concatenate([
        jnp.arange(0 * H, 1 * H),      # i
        jnp.arange(1 * H, 2 * H),      # f
        jnp.arange(3 * H, 4 * H),      # o
        jnp.arange(2 * H, 3 * H),      # g
    ])
    wih_t = jnp.transpose(w_ih[perm]).astype(jnp.float32)               # (D, 4H)
    whh_t = jnp.transpose(w_hh[perm]).astype(jnp.float32)               # (H, 4H)
    b_comb = (b_ih + b_hh)[perm].reshape(1, 4 * H).astype(jnp.float32)  # (1, 4H)
    wd_row = w_dense.reshape(1, H).astype(jnp.float32)                  # (1, H)
    bd = b_dense.reshape(1, 1).astype(jnp.float32)                      # (1, 1)

    # Time-major flatten in XLA (free at this size): row t*B + b == x[b, t].
    x_tm = jnp.transpose(x, (1, 0, 2)).reshape(T * B, D).astype(jnp.float32)

    vmem_spec = pl.BlockSpec(memory_space=pltpu.MemorySpace.VMEM)
    kernel = functools.partial(lstm_classifier_kernel, batch=B, seq_len=T)

    cost = pl.CostEstimate(
        flops=2 * T * B * D * 4 * H + 2 * T * B * H * 4 * H + 2 * B * H,
        transcendentals=T * (B * 3 * H + 2 * B * H) + B,
        bytes_accessed=4 * (T * B * D + D * 4 * H + H * 4 * H + 4 * H + 1 + H + 1 + B),
    )

    # TODO(synk): at production B/T, add grid=(B//tb,) with
    # dimension_semantics=("parallel",) (uses both v7x TensorCores), stream the
    # sequence via a (tb, tt, D) BlockSpec over an "arbitrary" T axis carrying
    # h/c in VMEM scratch, and set vmem_limit_bytes (v7x has only 64 MiB VMEM).
    return pl.pallas_call(
        kernel,
        out_shape=jax.ShapeDtypeStruct((B, 1), jnp.float32),
        in_specs=[vmem_spec] * 6,
        out_specs=vmem_spec,
        cost_estimate=cost,
    )(x_tm, wih_t, whh_t, b_comb, wd_row, bd)


def _reference_forward(x, w_ih, w_hh, b_ih, b_hh, w_dense, b_dense):
    """Pure-JAX f32 reference matching torch.nn.LSTM + Linear + sigmoid."""
    B, T, D = x.shape
    H = w_hh.shape[1]
    hi = jax.lax.Precision.HIGHEST
    h = jnp.zeros((B, H), jnp.float32)
    c = jnp.zeros((B, H), jnp.float32)
    for t in range(T):
        gates = (jnp.dot(x[:, t, :], w_ih.T, precision=hi)
                 + jnp.dot(h, w_hh.T, precision=hi) + b_ih + b_hh)
        i_g = jax.nn.sigmoid(gates[:, 0:H])
        f_g = jax.nn.sigmoid(gates[:, H:2 * H])
        g_g = jnp.tanh(gates[:, 2 * H:3 * H])
        o_g = jax.nn.sigmoid(gates[:, 3 * H:4 * H])
        c = f_g * c + i_g * g_g
        h = o_g * jnp.tanh(c)
    return jax.nn.sigmoid(jnp.dot(h, w_dense.T, precision=hi) + b_dense)


if __name__ == "__main__":
    # Small shapes consistent with the module: batch=2, seq=8, input_dim=4, hidden=16.
    B, T, D, H = 2, 8, 4, 16
    TARGET_DIM = 1

    key = jax.random.PRNGKey(0)
    k = jax.random.split(key, 7)
    bound = 1.0 / jnp.sqrt(H)  # PyTorch default LSTM / Linear init range

    x = jax.random.normal(k[0], (B, T, D), dtype=jnp.float32)
    w_ih = jax.random.uniform(k[1], (4 * H, D), minval=-bound, maxval=bound, dtype=jnp.float32)
    w_hh = jax.random.uniform(k[2], (4 * H, H), minval=-bound, maxval=bound, dtype=jnp.float32)
    b_ih = jax.random.uniform(k[3], (4 * H,), minval=-bound, maxval=bound, dtype=jnp.float32)
    b_hh = jax.random.uniform(k[4], (4 * H,), minval=-bound, maxval=bound, dtype=jnp.float32)
    w_dense = jax.random.uniform(k[5], (TARGET_DIM, H), minval=-bound, maxval=bound, dtype=jnp.float32)
    b_dense = jax.random.uniform(k[6], (TARGET_DIM,), minval=-bound, maxval=bound, dtype=jnp.float32)

    out = lstm_classifier_forward(x, w_ih, w_hh, b_ih, b_hh, w_dense, b_dense)
    out = jax.block_until_ready(out)

    ref = _reference_forward(x, w_ih, w_hh, b_ih, b_hh, w_dense, b_dense)
    assert out.shape == (B, TARGET_DIM)
    # Kernel is pure f32 now (no bf16 matmuls), so the tolerance is tight.
    assert jnp.allclose(out, ref, atol=1e-4, rtol=1e-4), (out, ref)

    print("KERNEL_OK")
</pallas_src>

<mosaic_0001>
module attributes {stable_mosaic.version = 11 : i64} {
  func.func @lstm_classifier_kernel(%arg0: memref<16x4xf32, #tpu.memory_space<vmem>>, %arg1: memref<4x64xf32, #tpu.memory_space<vmem>>, %arg2: memref<16x64xf32, #tpu.memory_space<vmem>>, %arg3: memref<1x64xf32, #tpu.memory_space<vmem>>, %arg4: memref<1x16xf32, #tpu.memory_space<vmem>>, %arg5: memref<1x1xf32, #tpu.memory_space<vmem>>, %arg6: memref<2x1xf32, #tpu.memory_space<vmem>>) attributes {dimension_semantics = [], scalar_prefetch = 0 : i64, scratch_operands = 0 : i64, tpu.core_type = #tpu.core_type<tc>} {
    %c0 = arith.constant 0 : index
    %c0_0 = arith.constant 0 : index
    %0 = vector.load %arg0[%c0, %c0_0] : memref<16x4xf32, #tpu.memory_space<vmem>>, vector<16x4xf32>
    %c0_1 = arith.constant 0 : index
    %c0_2 = arith.constant 0 : index
    %1 = vector.load %arg1[%c0_1, %c0_2] : memref<4x64xf32, #tpu.memory_space<vmem>>, vector<4x64xf32>
    %c0_3 = arith.constant 0 : index
    %c0_4 = arith.constant 0 : index
    %2 = vector.load %arg2[%c0_3, %c0_4] : memref<16x64xf32, #tpu.memory_space<vmem>>, vector<16x64xf32>
    %c0_5 = arith.constant 0 : index
    %c0_6 = arith.constant 0 : index
    %3 = vector.load %arg3[%c0_5, %c0_6] : memref<1x64xf32, #tpu.memory_space<vmem>>, vector<1x64xf32>
    %4 = vector.extract_strided_slice %0 {offsets = [0, 0], sizes = [16, 1], strides = [1, 1]} : vector<16x4xf32> to vector<16x1xf32>
    %5 = vector.extract_strided_slice %1 {offsets = [0, 0], sizes = [1, 64], strides = [1, 1]} : vector<4x64xf32> to vector<1x64xf32>
    %6 = vector.broadcast %4 : vector<16x1xf32> to vector<16x64xf32>
    %7 = vector.broadcast %5 : vector<1x64xf32> to vector<16x64xf32>
    %8 = arith.mulf %6, %7 : vector<16x64xf32>
    %9 = vector.extract_strided_slice %0 {offsets = [0, 1], sizes = [16, 1], strides = [1, 1]} : vector<16x4xf32> to vector<16x1xf32>
    %10 = vector.extract_strided_slice %1 {offsets = [1, 0], sizes = [1, 64], strides = [1, 1]} : vector<4x64xf32> to vector<1x64xf32>
    %11 = vector.broadcast %9 : vector<16x1xf32> to vector<16x64xf32>
    %12 = vector.broadcast %10 : vector<1x64xf32> to vector<16x64xf32>
    %13 = arith.mulf %11, %12 : vector<16x64xf32>
    %14 = vector.extract_strided_slice %0 {offsets = [0, 2], sizes = [16, 1], strides = [1, 1]} : vector<16x4xf32> to vector<16x1xf32>
    %15 = vector.extract_strided_slice %1 {offsets = [2, 0], sizes = [1, 64], strides = [1, 1]} : vector<4x64xf32> to vector<1x64xf32>
    %16 = vector.broadcast %14 : vector<16x1xf32> to vector<16x64xf32>
    %17 = vector.broadcast %15 : vector<1x64xf32> to vector<16x64xf32>
    %18 = arith.mulf %16, %17 : vector<16x64xf32>
    %19 = vector.extract_strided_slice %0 {offsets = [0, 3], sizes = [16, 1], strides = [1, 1]} : vector<16x4xf32> to vector<16x1xf32>
    %20 = vector.extract_strided_slice %1 {offsets = [3, 0], sizes = [1, 64], strides = [1, 1]} : vector<4x64xf32> to vector<1x64xf32>
    %21 = vector.broadcast %19 : vector<16x1xf32> to vector<16x64xf32>
    %22 = vector.broadcast %20 : vector<1x64xf32> to vector<16x64xf32>
    %23 = arith.mulf %21, %22 : vector<16x64xf32>
    %24 = arith.addf %8, %13 : vector<16x64xf32>
    %25 = arith.addf %18, %23 : vector<16x64xf32>
    %26 = arith.addf %24, %25 : vector<16x64xf32>
    %27 = vector.broadcast %3 : vector<1x64xf32> to vector<16x64xf32>
    %28 = arith.addf %27, %26 : vector<16x64xf32>
    %cst = arith.constant 0.000000e+00 : f32
    %29 = vector.broadcast %cst : f32 to vector<2x16xf32>
    %30 = vector.extract_strided_slice %28 {offsets = [0, 0], sizes = [2, 64], strides = [1, 1]} : vector<16x64xf32> to vector<2x64xf32>
    %31 = vector.extract_strided_slice %30 {offsets = [0, 0], sizes = [2, 48], strides = [1, 1]} : vector<2x64xf32> to vector<2x48xf32>
    %32 = arith.negf %31 : vector<2x48xf32>
    %33 = math.exp %32 : vector<2x48xf32>
    %cst_7 = arith.constant 1.000000e+00 : f32
    %34 = vector.broadcast %cst_7 : f32 to vector<2x48xf32>
    %35 = arith.addf %34, %33 : vector<2x48xf32>
    %36 = arith.divf %34, %35 : vector<2x48xf32>
    %37 = vector.extract_strided_slice %30 {offsets = [0, 48], sizes = [2, 16], strides = [1, 1]} : vector<2x64xf32> to vector<2x16xf32>
    %38 = math.tanh %37 : vector<2x16xf32>
    %39 = vector.extract_strided_slice %36 {offsets = [0, 0], sizes = [2, 16], strides = [1, 1]} : vector<2x48xf32> to vector<2x16xf32>
    %40 = vector.extract_strided_slice %36 {offsets = [0, 16], sizes = [2, 16], strides = [1, 1]} : vector<2x48xf32> to vector<2x16xf32>
    %41 = vector.extract_strided_slice %36 {offsets = [0, 32], sizes = [2, 16], strides = [1, 1]} : vector<2x48xf32> to vector<2x16xf32>
    %42 = arith.mulf %40, %29 : vector<2x16xf32>
    %43 = arith.mulf %39, %38 : vector<2x16xf32>
    %44 = arith.addf %42, %43 : vector<2x16xf32>
    %45 = math.tanh %44 : vector<2x16xf32>
    %46 = arith.mulf %41, %45 : vector<2x16xf32>
    %47 = vector.extract_strided_slice %28 {offsets = [2, 0], sizes = [2, 64], strides = [1, 1]} : vector<16x64xf32> to vector<2x64xf32>
    %48 = vector.extract_strided_slice %46 {offsets = [0, 0], sizes = [2, 1], strides = [1, 1]} : vector<2x16xf32> to vector<2x1xf32>
    %49 = vector.extract_strided_slice %2 {offsets = [0, 0], sizes = [1, 64], strides = [1, 1]} : vector<16x64xf32> to vector<1x64xf32>
    %50 = vector.broadcast %48 : vector<2x1xf32> to vector<2x64xf32>
    %51 = vector.broadcast %49 : vector<1x64xf32> to vector<2x64xf32>
    %52 = arith.mulf %50, %51 : vector<2x64xf32>
    %53 = vector.extract_strided_slice %46 {offsets = [0, 1], sizes = [2, 1], strides = [1, 1]} : vector<2x16xf32> to vector<2x1xf32>
    %54 = vector.extract_strided_slice %2 {offsets = [1, 0], sizes = [1, 64], strides = [1, 1]} : vector<16x64xf32> to vector<1x64xf32>
    %55 = vector.broadcast %53 : vector<2x1xf32> to vector<2x64xf32>
    %56 = vector.broadcast %54 : vector<1x64xf32> to vector<2x64xf32>
    %57 = arith.mulf %55, %56 : vector<2x64xf32>
    %58 = vector.extract_strided_slice %46 {offsets = [0, 2], sizes = [2, 1], strides = [1, 1]} : vector<2x16xf32> to vector<2x1xf32>
    %59 = vector.extract_strided_slice %2 {offsets = [2, 0], sizes = [1, 64], strides = [1, 1]} : vector<16x64xf32> to vector<1x64xf32>
    %60 = vector.broadcast %58 : vector<2x1xf32> to vector<2x64xf32>
    %61 = vector.broadcast %59 : vector<1x64xf32> to vector<2x64xf32>
    %62 = arith.mulf %60, %61 : vector<2x64xf32>
    %63 = vector.extract_strided_slice %46 {offsets = [0, 3], sizes = [2, 1], strides = [1, 1]} : vector<2x16xf32> to vector<2x1xf32>
    %64 = vector.extract_strided_slice %2 {offsets = [3, 0], sizes = [1, 64], strides = [1, 1]} : vector<16x64xf32> to vector<1x64xf32>
    %65 = vector.broadcast %63 : vector<2x1xf32> to vector<2x64xf32>
    %66 = vector.broadcast %64 : vector<1x64xf32> to vector<2x64xf32>
    %67 = arith.mulf %65, %66 : vector<2x64xf32>
    %68 = vector.extract_strided_slice %46 {offsets = [0, 4], sizes = [2, 1], strides = [1, 1]} : vector<2x16xf32> to vector<2x1xf32>
    %69 = vector.extract_strided_slice %2 {offsets = [4, 0], sizes = [1, 64], strides = [1, 1]} : vector<16x64xf32> to vector<1x64xf32>
    %70 = vector.broadcast %68 : vector<2x1xf32> to vector<2x64xf32>
    %71 = vector.broadcast %69 : vector<1x64xf32> to vector<2x64xf32>
    %72 = arith.mulf %70, %71 : vector<2x64xf32>
    %73 = vector.extract_strided_slice %46 {offsets = [0, 5], sizes = [2, 1], strides = [1, 1]} : vector<2x16xf32> to vector<2x1xf32>
    %74 = vector.extract_strided_slice %2 {offsets = [5, 0], sizes = [1, 64], strides = [1, 1]} : vector<16x64xf32> to vector<1x64xf32>
    %75 = vector.broadcast %73 : vector<2x1xf32> to vector<2x64xf32>
    %76 = vector.broadcast %74 : vector<1x64xf32> to vector<2x64xf32>
    %77 = arith.mulf %75, %76 : vector<2x64xf32>
    %78 = vector.extract_strided_slice %46 {offsets = [0, 6], sizes = [2, 1], strides = [1, 1]} : vector<2x16xf32> to vector<2x1xf32>
    %79 = vector.extract_strided_slice %2 {offsets = [6, 0], sizes = [1, 64], strides = [1, 1]} : vector<16x64xf32> to vector<1x64xf32>
    %80 = vector.broadcast %78 : vector<2x1xf32> to vector<2x64xf32>
    %81 = vector.broadcast %79 : vector<1x64xf32> to vector<2x64xf32>
    %82 = arith.mulf %80, %81 : vector<2x64xf32>
    %83 = vector.extract_strided_slice %46 {offsets = [0, 7], sizes = [2, 1], strides = [1, 1]} : vector<2x16xf32> to vector<2x1xf32>
    %84 = vector.extract_strided_slice %2 {offsets = [7, 0], sizes = [1, 64], strides = [1, 1]} : vector<16x64xf32> to vector<1x64xf32>
    %85 = vector.broadcast %83 : vector<2x1xf32> to vector<2x64xf32>
    %86 = vector.broadcast %84 : vector<1x64xf32> to vector<2x64xf32>
    %87 = arith.mulf %85, %86 : vector<2x64xf32>
    %88 = vector.extract_strided_slice %46 {offsets = [0, 8], sizes = [2, 1], strides = [1, 1]} : vector<2x16xf32> to vector<2x1xf32>
    %89 = vector.extract_strided_slice %2 {offsets = [8, 0], sizes = [1, 64], strides = [1, 1]} : vector<16x64xf32> to vector<1x64xf32>
    %90 = vector.broadcast %88 : vector<2x1xf32> to vector<2x64xf32>
    %91 = vector.broadcast %89 : vector<1x64xf32> to vector<2x64xf32>
    %92 = arith.mulf %90, %91 : vector<2x64xf32>
    %93 = vector.extract_strided_slice %46 {offsets = [0, 9], sizes = [2, 1], strides = [1, 1]} : vector<2x16xf32> to vector<2x1xf32>
    %94 = vector.extract_strided_slice %2 {offsets = [9, 0], sizes = [1, 64], strides = [1, 1]} : vector<16x64xf32> to vector<1x64xf32>
    %95 = vector.broadcast %93 : vector<2x1xf32> to vector<2x64xf32>
    %96 = vector.broadcast %94 : vector<1x64xf32> to vector<2x64xf32>
    %97 = arith.mulf %95, %96 : vector<2x64xf32>
    %98 = vector.extract_strided_slice %46 {offsets = [0, 10], sizes = [2, 1], strides = [1, 1]} : vector<2x16xf32> to vector<2x1xf32>
    %99 = vector.extract_strided_slice %2 {offsets = [10, 0], sizes = [1, 64], strides = [1, 1]} : vector<16x64xf32> to vector<1x64xf32>
    %100 = vector.broadcast %98 : vector<2x1xf32> to vector<2x64xf32>
    %101 = vector.broadcast %99 : vector<1x64xf32> to vector<2x64xf32>
    %102 = arith.mulf %100, %101 : vector<2x64xf32>
    %103 = vector.extract_strided_slice %46 {offsets = [0, 11], sizes = [2, 1], strides = [1, 1]} : vector<2x16xf32> to vector<2x1xf32>
    %104 = vector.extract_strided_slice %2 {offsets = [11, 0], sizes = [1, 64], strides = [1, 1]} : vector<16x64xf32> to vector<1x64xf32>
    %105 = vector.broadcast %103 : vector<2x1xf32> to vector<2x64xf32>
    %106 = vector.broadcast %104 : vector<1x64xf32> to vector<2x64xf32>
    %107 = arith.mulf %105, %106 : vector<2x64xf32>
    %108 = vector.extract_strided_slice %46 {offsets = [0, 12], sizes = [2, 1], strides = [1, 1]} : vector<2x16xf32> to vector<2x1xf32>
    %109 = vector.extract_strided_slice %2 {offsets = [12, 0], sizes = [1, 64], strides = [1, 1]} : vector<16x64xf32> to vector<1x64xf32>
    %110 = vector.broadcast %108 : vector<2x1xf32> to vector<2x64xf32>
    %111 = vector.broadcast %109 : vector<1x64xf32> to vector<2x64xf32>
    %112 = arith.mulf %110, %111 : vector<2x64xf32>
    %113 = vector.extract_strided_slice %46 {offsets = [0, 13], sizes = [2, 1], strides = [1, 1]} : vector<2x16xf32> to vector<2x1xf32>
    %114 = vector.extract_strided_slice %2 {offsets = [13, 0], sizes = [1, 64], strides = [1, 1]} : vector<16x64xf32> to vector<1x64xf32>
    %115 = vector.broadcast %113 : vector<2x1xf32> to vector<2x64xf32>
    %116 = vector.broadcast %114 : vector<1x64xf32> to vector<2x64xf32>
    %117 = arith.mulf %115, %116 : vector<2x64xf32>
    %118 = vector.extract_strided_slice %46 {offsets = [0, 14], sizes = [2, 1], strides = [1, 1]} : vector<2x16xf32> to vector<2x1xf32>
    %119 = vector.extract_strided_slice %2 {offsets = [14, 0], sizes = [1, 64], strides = [1, 1]} : vector<16x64xf32> to vector<1x64xf32>
    %120 = vector.broadcast %118 : vector<2x1xf32> to vector<2x64xf32>
    %121 = vector.broadcast %119 : vector<1x64xf32> to vector<2x64xf32>
    %122 = arith.mulf %120, %121 : vector<2x64xf32>
    %123 = vector.extract_strided_slice %46 {offsets = [0, 15], sizes = [2, 1], strides = [1, 1]} : vector<2x16xf32> to vector<2x1xf32>
    %124 = vector.extract_strided_slice %2 {offsets = [15, 0], sizes = [1, 64], strides = [1, 1]} : vector<16x64xf32> to vector<1x64xf32>
    %125 = vector.broadcast %123 : vector<2x1xf32> to vector<2x64xf32>
    %126 = vector.broadcast %124 : vector<1x64xf32> to vector<2x64xf32>
    %127 = arith.mulf %125, %126 : vector<2x64xf32>
    %128 = arith.addf %52, %57 : vector<2x64xf32>
    %129 = arith.addf %62, %67 : vector<2x64xf32>
    %130 = arith.addf %72, %77 : vector<2x64xf32>
    %131 = arith.addf %82, %87 : vector<2x64xf32>
    %132 = arith.addf %92, %97 : vector<2x64xf32>
    %133 = arith.addf %102, %107 : vector<2x64xf32>
    %134 = arith.addf %112, %117 : vector<2x64xf32>
    %135 = arith.addf %122, %127 : vector<2x64xf32>
    %136 = arith.addf %128, %129 : vector<2x64xf32>
    %137 = arith.addf %130, %131 : vector<2x64xf32>
    %138 = arith.addf %132, %133 : vector<2x64xf32>
    %139 = arith.addf %134, %135 : vector<2x64xf32>
    %140 = arith.addf %136, %137 : vector<2x64xf32>
    %141 = arith.addf %138, %139 : vector<2x64xf32>
    %142 = arith.addf %140, %141 : vector<2x64xf32>
    %143 = arith.addf %47, %142 : vector<2x64xf32>
    %144 = vector.extract_strided_slice %143 {offsets = [0, 0], sizes = [2, 48], strides = [1, 1]} : vector<2x64xf32> to vector<2x48xf32>
    %145 = arith.negf %144 : vector<2x48xf32>
    %146 = math.exp %145 : vector<2x48xf32>
    %cst_8 = arith.constant 1.000000e+00 : f32
    %147 = vector.broadcast %cst_8 : f32 to vector<2x48xf32>
    %148 = arith.addf %147, %146 : vector<2x48xf32>
    %149 = arith.divf %147, %148 : vector<2x48xf32>
    %150 = vector.extract_strided_slice %143 {offsets = [0, 48], sizes = [2, 16], strides = [1, 1]} : vector<2x64xf32> to vector<2x16xf32>
    %151 = math.tanh %150 : vector<2x16xf32>
    %152 = vector.extract_strided_slice %149 {offsets = [0, 0], sizes = [2, 16], strides = [1, 1]} : vector<2x48xf32> to vector<2x16xf32>
    %153 = vector.extract_strided_slice %149 {offsets = [0, 16], sizes = [2, 16], strides = [1, 1]} : vector<2x48xf32> to vector<2x16xf32>
    %154 = vector.extract_strided_slice %149 {offsets = [0, 32], sizes = [2, 16], strides = [1, 1]} : vector<2x48xf32> to vector<2x16xf32>
    %155 = arith.mulf %153, %44 : vector<2x16xf32>
    %156 = arith.mulf %152, %151 : vector<2x16xf32>
    %157 = arith.addf %155, %156 : vector<2x16xf32>
    %158 = math.tanh %157 : vector<2x16xf32>
    %159 = arith.mulf %154, %158 : vector<2x16xf32>
    %160 = vector.extract_strided_slice %28 {offsets = [4, 0], sizes = [2, 64], strides = [1, 1]} : vector<16x64xf32> to vector<2x64xf32>
    %161 = vector.extract_strided_slice %159 {offsets = [0, 0], sizes = [2, 1], strides = [1, 1]} : vector<2x16xf32> to vector<2x1xf32>
    %162 = vector.extract_strided_slice %2 {offsets = [0, 0], sizes = [1, 64], strides = [1, 1]} : vector<16x64xf32> to vector<1x64xf32>
    %163 = vector.broadcast %161 : vector<2x1xf32> to vector<2x64xf32>
    %164 = vector.broadcast %162 : vector<1x64xf32> to vector<2x64xf32>
    %165 = arith.mulf %163, %164 : vector<2x64xf32>
    %166 = vector.extract_strided_slice %159 {offsets = [0, 1], sizes = [2, 1], strides = [1, 1]} : vector<2x16xf32> to vector<2x1xf32>
    %167 = vector.extract_strided_slice %2 {offsets = [1, 0], sizes = [1, 64], strides = [1, 1]} : vector<16x64xf32> to vector<1x64xf32>
    %168 = vector.broadcast %166 : vector<2x1xf32> to vector<2x64xf32>
    %169 = vector.broadcast %167 : vector<1x64xf32> to vector<2x64xf32>
    %170 = arith.mulf %168, %169 : vector<2x64xf32>
    %171 = vector.extract_strided_slice %159 {offsets = [0, 2], sizes = [2, 1], strides = [1, 1]} : vector<2x16xf32> to vector<2x1xf32>
    %172 = vector.extract_strided_slice %2 {offsets = [2, 0], sizes = [1, 64], strides = [1, 1]} : vector<16x64xf32> to vector<1x64xf32>
    %173 = vector.broadcast %171 : vector<2x1xf32> to vector<2x64xf32>
    %174 = vector.broadcast %172 : vector<1x64xf32> to vector<2x64xf32>
    %175 = arith.mulf %173, %174 : vector<2x64xf32>
    %176 = vector.extract_strided_slice %159 {offsets = [0, 3], sizes = [2, 1], strides = [1, 1]} : vector<2x16xf32> to vector<2x1xf32>
    %177 = vector.extract_strided_slice %2 {offsets = [3, 0], sizes = [1, 64], strides = [1, 1]} : vector<16x64xf32> to vector<1x64xf32>
    %178 = vector.broadcast %176 : vector<2x1xf32> to vector<2x64xf32>
    %179 = vector.broadcast %177 : vector<1x64xf32> to vector<2x64xf32>
    %180 = arith.mulf %178, %179 : vector<2x64xf32>
    %181 = vector.extract_strided_slice %159 {offsets = [0, 4], sizes = [2, 1], strides = [1, 1]} : vector<2x16xf32> to vector<2x1xf32>
    %182 = vector.extract_strided_slice %2 {offsets = [4, 0], sizes = [1, 64], strides = [1, 1]} : vector<16x64xf32> to vector<1x64xf32>
    %183 = vector.broadcast %181 : vector<2x1xf32> to vector<2x64xf32>
    %184 = vector.broadcast %182 : vector<1x64xf32> to vector<2x64xf32>
    %185 = arith.mulf %183, %184 : vector<2x64xf32>
    %186 = vector.extract_strided_slice %159 {offsets = [0, 5], sizes = [2, 1], strides = [1, 1]} : vector<2x16xf32> to vector<2x1xf32>
    %187 = vector.extract_strided_slice %2 {offsets = [5, 0], sizes = [1, 64], strides = [1, 1]} : vector<16x64xf32> to vector<1x64xf32>
    %188 = vector.broadcast %186 : vector<2x1xf32> to vector<2x64xf32>
    %189 = vector.broadcast %187 : vector<1x64xf32> to vector<2x64xf32>
    %190 = arith.mulf %188, %189 : vector<2x64xf32>
    %191 = vector.extract_strided_slice %159 {offsets = [0, 6], sizes = [2, 1], strides = [1, 1]} : vector<2x16xf32> to vector<2x1xf32>
    %192 = vector.extract_strided_slice %2 {offsets = [6, 0], sizes = [1, 64], strides = [1, 1]} : vector<16x64xf32> to vector<1x64xf32>
    %193 = vector.broadcast %191 : vector<2x1xf32> to vector<2x64xf32>
    %194 = vector.broadcast %192 : vector<1x64xf32> to vector<2x64xf32>
    %195 = arith.mulf %193, %194 : vector<2x64xf32>
    %196 = vector.extract_strided_slice %159 {offsets = [0, 7], sizes = [2, 1], strides = [1, 1]} : vector<2x16xf32> to vector<2x1xf32>
    %197 = vector.extract_strided_slice %2 {offsets = [7, 0], sizes = [1, 64], strides = [1, 1]} : vector<16x64xf32> to vector<1x64xf32>
    %198 = vector.broadcast %196 : vector<2x1xf32> to vector<2x64xf32>
    %199 = vector.broadcast %197 : vector<1x64xf32> to vector<2x64xf32>
    %200 = arith.mulf %198, %199 : vector<2x64xf32>
    %201 = vector.extract_strided_slice %159 {offsets = [0, 8], sizes = [2, 1], strides = [1, 1]} : vector<2x16xf32> to vector<2x1xf32>
    %202 = vector.extract_strided_slice %2 {offsets = [8, 0], sizes = [1, 64], strides = [1, 1]} : vector<16x64xf32> to vector<1x64xf32>
    %203 = vector.broadcast %201 : vector<2x1xf32> to vector<2x64xf32>
    %204 = vector.broadcast %202 : vector<1x64xf32> to vector<2x64xf32>
    %205 = arith.mulf %203, %204 : vector<2x64xf32>
    %206 = vector.extract_strided_slice %159 {offsets = [0, 9], sizes = [2, 1], strides = [1, 1]} : vector<2x16xf32> to vector<2x1xf32>
    %207 = vector.extract_strided_slice %2 {offsets = [9, 0], sizes = [1, 64], strides = [1, 1]} : vector<16x64xf32> to vector<1x64xf32>
    %208 = vector.broadcast %206 : vector<2x1xf32> to vector<2x64xf32>
    %209 = vector.broadcast %207 : vector<1x64xf32> to vector<2x64xf32>
    %210 = arith.mulf %208, %209 : vector<2x64xf32>
    %211 = vector.extract_strided_slice %159 {offsets = [0, 10], sizes = [2, 1], strides = [1, 1]} : vector<2x16xf32> to vector<2x1xf32>
    %212 = vector.extract_strided_slice %2 {offsets = [10, 0], sizes = [1, 64], strides = [1, 1]} : vector<16x64xf32> to vector<1x64xf32>
    %213 = vector.broadcast %211 : vector<2x1xf32> to vector<2x64xf32>
    %214 = vector.broadcast %212 : vector<1x64xf32> to vector<2x64xf32>
    %215 = arith.mulf %213, %214 : vector<2x64xf32>
    %216 = vector.extract_strided_slice %159 {offsets = [0, 11], sizes = [2, 1], strides = [1, 1]} : vector<2x16xf32> to vector<2x1xf32>
    %217 = vector.extract_strided_slice %2 {offsets = [11, 0], sizes = [1, 64], strides = [1, 1]} : vector<16x64xf32> to vector<1x64xf32>
    %218 = vector.broadcast %216 : vector<2x1xf32> to vector<2x64xf32>
    %219 = vector.broadcast %217 : vector<1x64xf32> to vector<2x64xf32>
    %220 = arith.mulf %218, %219 : vector<2x64xf32>
    %221 = vector.extract_strided_slice %159 {offsets = [0, 12], sizes = [2, 1], strides = [1, 1]} : vector<2x16xf32> to vector<2x1xf32>
    %222 = vector.extract_strided_slice %2 {offsets = [12, 0], sizes = [1, 64], strides = [1, 1]} : vector<16x64xf32> to vector<1x64xf32>
    %223 = vector.broadcast %221 : vector<2x1xf32> to vector<2x64xf32>
    %224 = vector.broadcast %222 : vector<1x64xf32> to vector<2x64xf32>
    %225 = arith.mulf %223, %224 : vector<2x64xf32>
    %226 = vector.extract_strided_slice %159 {offsets = [0, 13], sizes = [2, 1], strides = [1, 1]} : vector<2x16xf32> to vector<2x1xf32>
    %227 = vector.extract_strided_slice %2 {offsets = [13, 0], sizes = [1, 64], strides = [1, 1]} : vector<16x64xf32> to vector<1x64xf32>
    %228 = vector.broadcast %226 : vector<2x1xf32> to vector<2x64xf32>
    %229 = vector.broadcast %227 : vector<1x64xf32> to vector<2x64xf32>
    %230 = arith.mulf %228, %229 : vector<2x64xf32>
    %231 = vector.extract_strided_slice %159 {offsets = [0, 14], sizes = [2, 1], strides = [1, 1]} : vector<2x16xf32> to vector<2x1xf32>
    %232 = vector.extract_strided_slice %2 {offsets = [14, 0], sizes = [1, 64], strides = [1, 1]} : vector<16x64xf32> to vector<1x64xf32>
    %233 = vector.broadcast %231 : vector<2x1xf32> to vector<2x64xf32>
    %234 = vector.broadcast %232 : vector<1x64xf32> to vector<2x64xf32>
    %235 = arith.mulf %233, %234 : vector<2x64xf32>
    %236 = vector.extract_strided_slice %159 {offsets = [0, 15], sizes = [2, 1], strides = [1, 1]} : vector<2x16xf32> to vector<2x1xf32>
    %237 = vector.extract_strided_slice %2 {offsets = [15, 0], sizes = [1, 64], strides = [1, 1]} : vector<16x64xf32> to vector<1x64xf32>
    %238 = vector.broadcast %236 : vector<2x1xf32> to vector<2x64xf32>
    %239 = vector.broadcast %237 : vector<1x64xf32> to vector<2x64xf32>
    %240 = arith.mulf %238, %239 : vector<2x64xf32>
    %241 = arith.addf %165, %170 : vector<2x64xf32>
    %242 = arith.addf %175, %180 : vector<2x64xf32>
    %243 = arith.addf %185, %190 : vector<2x64xf32>
    %244 = arith.addf %195, %200 : vector<2x64xf32>
    %245 = arith.addf %205, %210 : vector<2x64xf32>
    %246 = arith.addf %215, %220 : vector<2x64xf32>
    %247 = arith.addf %225, %230 : vector<2x64xf32>
    %248 = arith.addf %235, %240 : vector<2x64xf32>
    %249 = arith.addf %241, %242 : vector<2x64xf32>
    %250 = arith.addf %243, %244 : vector<2x64xf32>
    %251 = arith.addf %245, %246 : vector<2x64xf32>
    %252 = arith.addf %247, %248 : vector<2x64xf32>
    %253 = arith.addf %249, %250 : vector<2x64xf32>
    %254 = arith.addf %251, %252 : vector<2x64xf32>
    %255 = arith.addf %253, %254 : vector<2x64xf32>
    %256 = arith.addf %160, %255 : vector<2x64xf32>
    %257 = vector.extract_strided_slice %256 {offsets = [0, 0], sizes = [2, 48], strides = [1, 1]} : vector<2x64xf32> to vector<2x48xf32>
    %258 = arith.negf %257 : vector<2x48xf32>
    %259 = math.exp %258 : vector<2x48xf32>
    %cst_9 = arith.constant 1.000000e+00 : f32
    %260 = vector.broadcast %cst_9 : f32 to vector<2x48xf32>
    %261 = arith.addf %260, %259 : vector<2x48xf32>
    %262 = arith.divf %260, %261 : vector<2x48xf32>
    %263 = vector.extract_strided_slice %256 {offsets = [0, 48], sizes = [2, 16], strides = [1, 1]} : vector<2x64xf32> to vector<2x16xf32>
    %264 = math.tanh %263 : vector<2x16xf32>
    %265 = vector.extract_strided_slice %262 {offsets = [0, 0], sizes = [2, 16], strides = [1, 1]} : vector<2x48xf32> to vector<2x16xf32>
    %266 = vector.extract_strided_slice %262 {offsets = [0, 16], sizes = [2, 16], strides = [1, 1]} : vector<2x48xf32> to vector<2x16xf32>
    %267 = vector.extract_strided_slice %262 {offsets = [0, 32], sizes = [2, 16], strides = [1, 1]} : vector<2x48xf32> to vector<2x16xf32>
    %268 = arith.mulf %266, %157 : vector<2x16xf32>
    %269 = arith.mulf %265, %264 : vector<2x16xf32>
    %270 = arith.addf %268, %269 : vector<2x16xf32>
    %271 = math.tanh %270 : vector<2x16xf32>
    %272 = arith.mulf %267, %271 : vector<2x16xf32>
    %273 = vector.extract_strided_slice %28 {offsets = [6, 0], sizes = [2, 64], strides = [1, 1]} : vector<16x64xf32> to vector<2x64xf32>
    %274 = vector.extract_strided_slice %272 {offsets = [0, 0], sizes = [2, 1], strides = [1, 1]} : vector<2x16xf32> to vector<2x1xf32>
    %275 = vector.extract_strided_slice %2 {offsets = [0, 0], sizes = [1, 64], strides = [1, 1]} : vector<16x64xf32> to vector<1x64xf32>
    %276 = vector.broadcast %274 : vector<2x1xf32> to vector<2x64xf32>
    %277 = vector.broadcast %275 : vector<1x64xf32> to vector<2x64xf32>
    %278 = arith.mulf %276, %277 : vector<2x64xf32>
    %279 = vector.extract_strided_slice %272 {offsets = [0, 1], sizes = [2, 1], strides = [1, 1]} : vector<2x16xf32> to vector<2x1xf32>
    %280 = vector.extract_strided_slice %2 {offsets = [1, 0], sizes = [1, 64], strides = [1, 1]} : vector<16x64xf32> to vector<1x64xf32>
    %281 = vector.broadcast %279 : vector<2x1xf32> to vector<2x64xf32>
    %282 = vector.broadcast %280 : vector<1x64xf32> to vector<2x64xf32>
    %283 = arith.mulf %281, %282 : vector<2x64xf32>
    %284 = vector.extract_strided_slice %272 {offsets = [0, 2], sizes = [2, 1], strides = [1, 1]} : vector<2x16xf32> to vector<2x1xf32>
    %285 = vector.extract_strided_slice %2 {offsets = [2, 0], sizes = [1, 64], strides = [1, 1]} : vector<16x64xf32> to vector<1x64xf32>
    %286 = vector.broadcast %284 : vector<2x1xf32> to vector<2x64xf32>
    %287 = vector.broadcast %285 : vector<1x64xf32> to vector<2x64xf32>
    %288 = arith.mulf %286, %287 : vector<2x64xf32>
    %289 = vector.extract_strided_slice %272 {offsets = [0, 3], sizes = [2, 1], strides = [1, 1]} : vector<2x16xf32> to vector<2x1xf32>
    %290 = vector.extract_strided_slice %2 {offsets = [3, 0], sizes = [1, 64], strides = [1, 1]} : vector<16x64xf32> to vector<1x64xf32>
    %291 = vector.broadcast %289 : vector<2x1xf32> to vector<2x64xf32>
    %292 = vector.broadcast %290 : vector<1x64xf32> to vector<2x64xf32>
    %293 = arith.mulf %291, %292 : vector<2x64xf32>
    %294 = vector.extract_strided_slice %272 {offsets = [0, 4], sizes = [2, 1], strides = [1, 1]} : vector<2x16xf32> to vector<2x1xf32>
    %295 = vector.extract_strided_slice %2 {offsets = [4, 0], sizes = [1, 64], strides = [1, 1]} : vector<16x64xf32> to vector<1x64xf32>
    %296 = vector.broadcast %294 : vector<2x1xf32> to vector<2x64xf32>
    %297 = vector.broadcast %295 : vector<1x64xf32> to vector<2x64xf32>
    %298 = arith.mulf %296, %297 : vector<2x64xf32>
    %299 = vector.extract_strided_slice %272 {offsets = [0, 5], sizes = [2, 1], strides = [1, 1]} : vector<2x16xf32> to vector<2x1xf32>
    %300 = vector.extract_strided_slice %2 {offsets = [5, 0], sizes = [1, 64], strides = [1, 1]} : vector<16x64xf32> to vector<1x64xf32>
    %301 = vector.broadcast %299 : vector<2x1xf32> to vector<2x64xf32>
    %302 = vector.broadcast %300 : vector<1x64xf32> to vector<2x64xf32>
    %303 = arith.mulf %301, %302 : vector<2x64xf32>
    %304 = vector.extract_strided_slice %272 {offsets = [0, 6], sizes = [2, 1], strides = [1, 1]} : vector<2x16xf32> to vector<2x1xf32>
    %305 = vector.extract_strided_slice %2 {offsets = [6, 0], sizes = [1, 64], strides = [1, 1]} : vector<16x64xf32> to vector<1x64xf32>
    %306 = vector.broadcast %304 : vector<2x1xf32> to vector<2x64xf32>
    %307 = vector.broadcast %305 : vector<1x64xf32> to vector<2x64xf32>
    %308 = arith.mulf %306, %307 : vector<2x64xf32>
    %309 = vector.extract_strided_slice %272 {offsets = [0, 7], sizes = [2, 1], strides = [1, 1]} : vector<2x16xf32> to vector<2x1xf32>
    %310 = vector.extract_strided_slice %2 {offsets = [7, 0], sizes = [1, 64], strides = [1, 1]} : vector<16x64xf32> to vector<1x64xf32>
    %311 = vector.broadcast %309 : vector<2x1xf32> to vector<2x64xf32>
    %312 = vector.broadcast %310 : vector<1x64xf32> to vector<2x64xf32>
    %313 = arith.mulf %311, %312 : vector<2x64xf32>
    %314 = vector.extract_strided_slice %272 {offsets = [0, 8], sizes = [2, 1], strides = [1, 1]} : vector<2x16xf32> to vector<2x1xf32>
    %315 = vector.extract_strided_slice %2 {offsets = [8, 0], sizes = [1, 64], strides = [1, 1]} : vector<16x64xf32> to vector<1x64xf32>
    %316 = vector.broadcast %314 : vector<2x1xf32> to vector<2x64xf32>
    %317 = vector.broadcast %315 : vector<1x64xf32> to vector<2x64xf32>
    %318 = arith.mulf %316, %317 : vector<2x64xf32>
    %319 = vector.extract_strided_slice %272 {offsets = [0, 9], sizes = [2, 1], strides = [1, 1]} : vector<2x16xf32> to vector<2x1xf32>
    %320 = vector.extract_strided_slice %2 {offsets = [9, 0], sizes = [1, 64], strides = [1, 1]} : vector<16x64xf32> to vector<1x64xf32>
    %321 = vector.broadcast %319 : vector<2x1xf32> to vector<2x64xf32>
    %322 = vector.broadcast %320 : vector<1x64xf32> to vector<2x64xf32>
    %323 = arith.mulf %321, %322 : vector<2x64xf32>
    %324 = vector.extract_strided_slice %272 {offsets = [0, 10], sizes = [2, 1], strides = [1, 1]} : vector<2x16xf32> to vector<2x1xf32>
    %325 = vector.extract_strided_slice %2 {offsets = [10, 0], sizes = [1, 64], strides = [1, 1]} : vector<16x64xf32> to vector<1x64xf32>
    %326 = vector.broadcast %324 : vector<2x1xf32> to vector<2x64xf32>
    %327 = vector.broadcast %325 : vector<1x64xf32> to vector<2x64xf32>
    %328 = arith.mulf %326, %327 : vector<2x64xf32>
    %329 = vector.extract_strided_slice %272 {offsets = [0, 11], sizes = [2, 1], strides = [1, 1]} : vector<2x16xf32> to vector<2x1xf32>
    %330 = vector.extract_strided_slice %2 {offsets = [11, 0], sizes = [1, 64], strides = [1, 1]} : vector<16x64xf32> to vector<1x64xf32>
    %331 = vector.broadcast %329 : vector<2x1xf32> to vector<2x64xf32>
    %332 = vector.broadcast %330 : vector<1x64xf32> to vector<2x64xf32>
    %333 = arith.mulf %331, %332 : vector<2x64xf32>
    %334 = vector.extract_strided_slice %272 {offsets = [0, 12], sizes = [2, 1], strides = [1, 1]} : vector<2x16xf32> to vector<2x1xf32>
    %335 = vector.extract_strided_slice %2 {offsets = [12, 0], sizes = [1, 64], strides = [1, 1]} : vector<16x64xf32> to vector<1x64xf32>
    %336 = vector.broadcast %334 : vector<2x1xf32> to vector<2x64xf32>
    %337 = vector.broadcast %335 : vector<1x64xf32> to vector<2x64xf32>
    %338 = arith.mulf %336, %337 : vector<2x64xf32>
    %339 = vector.extract_strided_slice %272 {offsets = [0, 13], sizes = [2, 1], strides = [1, 1]} : vector<2x16xf32> to vector<2x1xf32>
    %340 = vector.extract_strided_slice %2 {offsets = [13, 0], sizes = [1, 64], strides = [1, 1]} : vector<16x64xf32> to vector<1x64xf32>
    %341 = vector.broadcast %339 : vector<2x1xf32> to vector<2x64xf32>
    %342 = vector.broadcast %340 : vector<1x64xf32> to vector<2x64xf32>
    %343 = arith.mulf %341, %342 : vector<2x64xf32>
    %344 = vector.extract_strided_slice %272 {offsets = [0, 14], sizes = [2, 1], strides = [1, 1]} : vector<2x16xf32> to vector<2x1xf32>
    %345 = vector.extract_strided_slice %2 {offsets = [14, 0], sizes = [1, 64], strides = [1, 1]} : vector<16x64xf32> to vector<1x64xf32>
    %346 = vector.broadcast %344 : vector<2x1xf32> to vector<2x64xf32>
    %347 = vector.broadcast %345 : vector<1x64xf32> to vector<2x64xf32>
    %348 = arith.mulf %346, %347 : vector<2x64xf32>
    %349 = vector.extract_strided_slice %272 {offsets = [0, 15], sizes = [2, 1], strides = [1, 1]} : vector<2x16xf32> to vector<2x1xf32>
    %350 = vector.extract_strided_slice %2 {offsets = [15, 0], sizes = [1, 64], strides = [1, 1]} : vector<16x64xf32> to vector<1x64xf32>
    %351 = vector.broadcast %349 : vector<2x1xf32> to vector<2x64xf32>
    %352 = vector.broadcast %350 : vector<1x64xf32> to vector<2x64xf32>
    %353 = arith.mulf %351, %352 : vector<2x64xf32>
    %354 = arith.addf %278, %283 : vector<2x64xf32>
    %355 = arith.addf %288, %293 : vector<2x64xf32>
    %356 = arith.addf %298, %303 : vector<2x64xf32>
    %357 = arith.addf %308, %313 : vector<2x64xf32>
    %358 = arith.addf %318, %323 : vector<2x64xf32>
    %359 = arith.addf %328, %333 : vector<2x64xf32>
    %360 = arith.addf %338, %343 : vector<2x64xf32>
    %361 = arith.addf %348, %353 : vector<2x64xf32>
    %362 = arith.addf %354, %355 : vector<2x64xf32>
    %363 = arith.addf %356, %357 : vector<2x64xf32>
    %364 = arith.addf %358, %359 : vector<2x64xf32>
    %365 = arith.addf %360, %361 : vector<2x64xf32>
    %366 = arith.addf %362, %363 : vector<2x64xf32>
    %367 = arith.addf %364, %365 : vector<2x64xf32>
    %368 = arith.addf %366, %367 : vector<2x64xf32>
    %369 = arith.addf %273, %368 : vector<2x64xf32>
    %370 = vector.extract_strided_slice %369 {offsets = [0, 0], sizes = [2, 48], strides = [1, 1]} : vector<2x64xf32> to vector<2x48xf32>
    %371 = arith.negf %370 : vector<2x48xf32>
    %372 = math.exp %371 : vector<2x48xf32>
    %cst_10 = arith.constant 1.000000e+00 : f32
    %373 = vector.broadcast %cst_10 : f32 to vector<2x48xf32>
    %374 = arith.addf %373, %372 : vector<2x48xf32>
    %375 = arith.divf %373, %374 : vector<2x48xf32>
    %376 = vector.extract_strided_slice %369 {offsets = [0, 48], sizes = [2, 16], strides = [1, 1]} : vector<2x64xf32> to vector<2x16xf32>
    %377 = math.tanh %376 : vector<2x16xf32>
    %378 = vector.extract_strided_slice %375 {offsets = [0, 0], sizes = [2, 16], strides = [1, 1]} : vector<2x48xf32> to vector<2x16xf32>
    %379 = vector.extract_strided_slice %375 {offsets = [0, 16], sizes = [2, 16], strides = [1, 1]} : vector<2x48xf32> to vector<2x16xf32>
    %380 = vector.extract_strided_slice %375 {offsets = [0, 32], sizes = [2, 16], strides = [1, 1]} : vector<2x48xf32> to vector<2x16xf32>
    %381 = arith.mulf %379, %270 : vector<2x16xf32>
    %382 = arith.mulf %378, %377 : vector<2x16xf32>
    %383 = arith.addf %381, %382 : vector<2x16xf32>
    %384 = math.tanh %383 : vector<2x16xf32>
    %385 = arith.mulf %380, %384 : vector<2x16xf32>
    %386 = vector.extract_strided_slice %28 {offsets = [8, 0], sizes = [2, 64], strides = [1, 1]} : vector<16x64xf32> to vector<2x64xf32>
    %387 = vector.extract_strided_slice %385 {offsets = [0, 0], sizes = [2, 1], strides = [1, 1]} : vector<2x16xf32> to vector<2x1xf32>
    %388 = vector.extract_strided_slice %2 {offsets = [0, 0], sizes = [1, 64], strides = [1, 1]} : vector<16x64xf32> to vector<1x64xf32>
    %389 = vector.broadcast %387 : vector<2x1xf32> to vector<2x64xf32>
    %390 = vector.broadcast %388 : vector<1x64xf32> to vector<2x64xf32>
    %391 = arith.mulf %389, %390 : vector<2x64xf32>
    %392 = vector.extract_strided_slice %385 {offsets = [0, 1], sizes = [2, 1], strides = [1, 1]} : vector<2x16xf32> to vector<2x1xf32>
    %393 = vector.extract_strided_slice %2 {offsets = [1, 0], sizes = [1, 64], strides = [1, 1]} : vector<16x64xf32> to vector<1x64xf32>
    %394 = vector.broadcast %392 : vector<2x1xf32> to vector<2x64xf32>
    %395 = vector.broadcast %393 : vector<1x64xf32> to vector<2x64xf32>
    %396 = arith.mulf %394, %395 : vector<2x64xf32>
    %397 = vector.extract_strided_slice %385 {offsets = [0, 2], sizes = [2, 1], strides = [1, 1]} : vector<2x16xf32> to vector<2x1xf32>
    %398 = vector.extract_strided_slice %2 {offsets = [2, 0], sizes = [1, 64], strides = [1, 1]} : vector<16x64xf32> to vector<1x64xf32>
    %399 = vector.broadcast %397 : vector<2x1xf32> to vector<2x64xf32>
    %400 = vector.broadcast %398 : vector<1x64xf32> to vector<2x64xf32>
    %401 = arith.mulf %399, %400 : vector<2x64xf32>
    %402 = vector.extract_strided_slice %385 {offsets = [0, 3], sizes = [2, 1], strides = [1, 1]} : vector<2x16xf32> to vector<2x1xf32>
    %403 = vector.extract_strided_slice %2 {offsets = [3, 0], sizes = [1, 64], strides = [1, 1]} : vector<16x64xf32> to vector<1x64xf32>
    %404 = vector.broadcast %402 : vector<2x1xf32> to vector<2x64xf32>
    %405 = vector.broadcast %403 : vector<1x64xf32> to vector<2x64xf32>
    %406 = arith.mulf %404, %405 : vector<2x64xf32>
    %407 = vector.extract_strided_slice %385 {offsets = [0, 4], sizes = [2, 1], strides = [1, 1]} : vector<2x16xf32> to vector<2x1xf32>
    %408 = vector.extract_strided_slice %2 {offsets = [4, 0], sizes = [1, 64], strides = [1, 1]} : vector<16x64xf32> to vector<1x64xf32>
    %409 = vector.broadcast %407 : vector<2x1xf32> to vector<2x64xf32>
    %410 = vector.broadcast %408 : vector<1x64xf32> to vector<2x64xf32>
    %411 = arith.mulf %409, %410 : vector<2x64xf32>
    %412 = vector.extract_strided_slice %385 {offsets = [0, 5], sizes = [2, 1], strides = [1, 1]} : vector<2x16xf32> to vector<2x1xf32>
    %413 = vector.extract_strided_slice %2 {offsets = [5, 0], sizes = [1, 64], strides = [1, 1]} : vector<16x64xf32> to vector<1x64xf32>
    %414 = vector.broadcast %412 : vector<2x1xf32> to vector<2x64xf32>
    %415 = vector.broadcast %413 : vector<1x64xf32> to vector<2x64xf32>
    %416 = arith.mulf %414, %415 : vector<2x64xf32>
    %417 = vector.extract_strided_slice %385 {offsets = [0, 6], sizes = [2, 1], strides = [1, 1]} : vector<2x16xf32> to vector<2x1xf32>
    %418 = vector.extract_strided_slice %2 {offsets = [6, 0], sizes = [1, 64], strides = [1, 1]} : vector<16x64xf32> to vector<1x64xf32>
    %419 = vector.broadcast %417 : vector<2x1xf32> to vector<2x64xf32>
    %420 = vector.broadcast %418 : vector<1x64xf32> to vector<2x64xf32>
    %421 = arith.mulf %419, %420 : vector<2x64xf32>
    %422 = vector.extract_strided_slice %385 {offsets = [0, 7], sizes = [2, 1], strides = [1, 1]} : vector<2x16xf32> to vector<2x1xf32>
    %423 = vector.extract_strided_slice %2 {offsets = [7, 0], sizes = [1, 64], strides = [1, 1]} : vector<16x64xf32> to vector<1x64xf32>
    %424 = vector.broadcast %422 : vector<2x1xf32> to vector<2x64xf32>
    %425 = vector.broadcast %423 : vector<1x64xf32> to vector<2x64xf32>
    %426 = arith.mulf %424, %425 : vector<2x64xf32>
    %427 = vector.extract_strided_slice %385 {offsets = [0, 8], sizes = [2, 1], strides = [1, 1]} : vector<2x16xf32> to vector<2x1xf32>
    %428 = vector.extract_strided_slice %2 {offsets = [8, 0], sizes = [1, 64], strides = [1, 1]} : vector<16x64xf32> to vector<1x64xf32>
    %429 = vector.broadcast %427 : vector<2x1xf32> to vector<2x64xf32>
    %430 = vector.broadcast %428 : vector<1x64xf32> to vector<2x64xf32>
    %431 = arith.mulf %429, %430 : vector<2x64xf32>
    %432 = vector.extract_strided_slice %385 {offsets = [0, 9], sizes = [2, 1], strides = [1, 1]} : vector<2x16xf32> to vector<2x1xf32>
    %433 = vector.extract_strided_slice %2 {offsets = [9, 0], sizes = [1, 64], strides = [1, 1]} : vector<16x64xf32> to vector<1x64xf32>
    %434 = vector.broadcast %432 : vector<2x1xf32> to vector<2x64xf32>
    %435 = vector.broadcast %433 : vector<1x64xf32> to vector<2x64xf32>
    %436 = arith.mulf %434, %435 : vector<2x64xf32>
    %437 = vector.extract_strided_slice %385 {offsets = [0, 10], sizes = [2, 1], strides = [1, 1]} : vector<2x16xf32> to vector<2x1xf32>
    %438 = vector.extract_strided_slice %2 {offsets = [10, 0], sizes = [1, 64], strides = [1, 1]} : vector<16x64xf32> to vector<1x64xf32>
    %439 = vector.broadcast %437 : vector<2x1xf32> to vector<2x64xf32>
    %440 = vector.broadcast %438 : vector<1x64xf32> to vector<2x64xf32>
    %441 = arith.mulf %439, %440 : vector<2x64xf32>
    %442 = vector.extract_strided_slice %385 {offsets = [0, 11], sizes = [2, 1], strides = [1, 1]} : vector<2x16xf32> to vector<2x1xf32>
    %443 = vector.extract_strided_slice %2 {offsets = [11, 0], sizes = [1, 64], strides = [1, 1]} : vector<16x64xf32> to vector<1x64xf32>
    %444 = vector.broadcast %442 : vector<2x1xf32> to vector<2x64xf32>
    %445 = vector.broadcast %443 : vector<1x64xf32> to vector<2x64xf32>
    %446 = arith.mulf %444, %445 : vector<2x64xf32>
    %447 = vector.extract_strided_slice %385 {offsets = [0, 12], sizes = [2, 1], strides = [1, 1]} : vector<2x16xf32> to vector<2x1xf32>
    %448 = vector.extract_strided_slice %2 {offsets = [12, 0], sizes = [1, 64], strides = [1, 1]} : vector<16x64xf32> to vector<1x64xf32>
    %449 = vector.broadcast %447 : vector<2x1xf32> to vector<2x64xf32>
    %450 = vector.broadcast %448 : vector<1x64xf32> to vector<2x64xf32>
    %451 = arith.mulf %449, %450 : vector<2x64xf32>
    %452 = vector.extract_strided_slice %385 {offsets = [0, 13], sizes = [2, 1], strides = [1, 1]} : vector<2x16xf32> to vector<2x1xf32>
    %453 = vector.extract_strided_slice %2 {offsets = [13, 0], sizes = [1, 64], strides = [1, 1]} : vector<16x64xf32> to vector<1x64xf32>
    %454 = vector.broadcast %452 : vector<2x1xf32> to vector<2x64xf32>
    %455 = vector.broadcast %453 : vector<1x64xf32> to vector<2x64xf32>
    %456 = arith.mulf %454, %455 : vector<2x64xf32>
    %457 = vector.extract_strided_slice %385 {offsets = [0, 14], sizes = [2, 1], strides = [1, 1]} : vector<2x16xf32> to vector<2x1xf32>
    %458 = vector.extract_strided_slice %2 {offsets = [14, 0], sizes = [1, 64], strides = [1, 1]} : vector<16x64xf32> to vector<1x64xf32>
    %459 = vector.broadcast %457 : vector<2x1xf32> to vector<2x64xf32>
    %460 = vector.broadcast %458 : vector<1x64xf32> to vector<2x64xf32>
    %461 = arith.mulf %459, %460 : vector<2x64xf32>
    %462 = vector.extract_strided_slice %385 {offsets = [0, 15], sizes = [2, 1], strides = [1, 1]} : vector<2x16xf32> to vector<2x1xf32>
    %463 = vector.extract_strided_slice %2 {offsets = [15, 0], sizes = [1, 64], strides = [1, 1]} : vector<16x64xf32> to vector<1x64xf32>
    %464 = vector.broadcast %462 : vector<2x1xf32> to vector<2x64xf32>
    %465 = vector.broadcast %463 : vector<1x64xf32> to vector<2x64xf32>
    %466 = arith.mulf %464, %465 : vector<2x64xf32>
    %467 = arith.addf %391, %396 : vector<2x64xf32>
    %468 = arith.addf %401, %406 : vector<2x64xf32>
    %469 = arith.addf %411, %416 : vector<2x64xf32>
    %470 = arith.addf %421, %426 : vector<2x64xf32>
    %471 = arith.addf %431, %436 : vector<2x64xf32>
    %472 = arith.addf %441, %446 : vector<2x64xf32>
    %473 = arith.addf %451, %456 : vector<2x64xf32>
    %474 = arith.addf %461, %466 : vector<2x64xf32>
    %475 = arith.addf %467, %468 : vector<2x64xf32>
    %476 = arith.addf %469, %470 : vector<2x64xf32>
    %477 = arith.addf %471, %472 : vector<2x64xf32>
    %478 = arith.addf %473, %474 : vector<2x64xf32>
    %479 = arith.addf %475, %476 : vector<2x64xf32>
    %480 = arith.addf %477, %478 : vector<2x64xf32>
    %481 = arith.addf %479, %480 : vector<2x64xf32>
    %482 = arith.addf %386, %481 : vector<2x64xf32>
    %483 = vector.extract_strided_slice %482 {offsets = [0, 0], sizes = [2, 48], strides = [1, 1]} : vector<2x64xf32> to vector<2x48xf32>
    %484 = arith.negf %483 : vector<2x48xf32>
    %485 = math.exp %484 : vector<2x48xf32>
    %cst_11 = arith.constant 1.000000e+00 : f32
    %486 = vector.broadcast %cst_11 : f32 to vector<2x48xf32>
    %487 = arith.addf %486, %485 : vector<2x48xf32>
    %488 = arith.divf %486, %487 : vector<2x48xf32>
    %489 = vector.extract_strided_slice %482 {offsets = [0, 48], sizes = [2, 16], strides = [1, 1]} : vector<2x64xf32> to vector<2x16xf32>
    %490 = math.tanh %489 : vector<2x16xf32>
    %491 = vector.extract_strided_slice %488 {offsets = [0, 0], sizes = [2, 16], strides = [1, 1]} : vector<2x48xf32> to vector<2x16xf32>
    %492 = vector.extract_strided_slice %488 {offsets = [0, 16], sizes = [2, 16], strides = [1, 1]} : vector<2x48xf32> to vector<2x16xf32>
    %493 = vector.extract_strided_slice %488 {offsets = [0, 32], sizes = [2, 16], strides = [1, 1]} : vector<2x48xf32> to vector<2x16xf32>
    %494 = arith.mulf %492, %383 : vector<2x16xf32>
    %495 = arith.mulf %491, %490 : vector<2x16xf32>
    %496 = arith.addf %494, %495 : vector<2x16xf32>
    %497 = math.tanh %496 : vector<2x16xf32>
    %498 = arith.mulf %493, %497 : vector<2x16xf32>
    %499 = vector.extract_strided_slice %28 {offsets = [10, 0], sizes = [2, 64], strides = [1, 1]} : vector<16x64xf32> to vector<2x64xf32>
    %500 = vector.extract_strided_slice %498 {offsets = [0, 0], sizes = [2, 1], strides = [1, 1]} : vector<2x16xf32> to vector<2x1xf32>
    %501 = vector.extract_strided_slice %2 {offsets = [0, 0], sizes = [1, 64], strides = [1, 1]} : vector<16x64xf32> to vector<1x64xf32>
    %502 = vector.broadcast %500 : vector<2x1xf32> to vector<2x64xf32>
    %503 = vector.broadcast %501 : vector<1x64xf32> to vector<2x64xf32>
    %504 = arith.mulf %502, %503 : vector<2x64xf32>
    %505 = vector.extract_strided_slice %498 {offsets = [0, 1], sizes = [2, 1], strides = [1, 1]} : vector<2x16xf32> to vector<2x1xf32>
    %506 = vector.extract_strided_slice %2 {offsets = [1, 0], sizes = [1, 64], strides = [1, 1]} : vector<16x64xf32> to vector<1x64xf32>
    %507 = vector.broadcast %505 : vector<2x1xf32> to vector<2x64xf32>
    %508 = vector.broadcast %506 : vector<1x64xf32> to vector<2x64xf32>
    %509 = arith.mulf %507, %508 : vector<2x64xf32>
    %510 = vector.extract_strided_slice %498 {offsets = [0, 2], sizes = [2, 1], strides = [1, 1]} : vector<2x16xf32> to vector<2x1xf32>
    %511 = vector.extract_strided_slice %2 {offsets = [2, 0], sizes = [1, 64], strides = [1, 1]} : vector<16x64xf32> to vector<1x64xf32>
    %512 = vector.broadcast %510 : vector<2x1xf32> to vector<2x64xf32>
    %513 = vector.broadcast %511 : vector<1x64xf32> to vector<2x64xf32>
    %514 = arith.mulf %512, %513 : vector<2x64xf32>
    %515 = vector.extract_strided_slice %498 {offsets = [0, 3], sizes = [2, 1], strides = [1, 1]} : vector<2x16xf32> to vector<2x1xf32>
    %516 = vector.extract_strided_slice %2 {offsets = [3, 0], sizes = [1, 64], strides = [1, 1]} : vector<16x64xf32> to vector<1x64xf32>
    %517 = vector.broadcast %515 : vector<2x1xf32> to vector<2x64xf32>
    %518 = vector.broadcast %516 : vector<1x64xf32> to vector<2x64xf32>
    %519 = arith.mulf %517, %518 : vector<2x64xf32>
    %520 = vector.extract_strided_slice %498 {offsets = [0, 4], sizes = [2, 1], strides = [1, 1]} : vector<2x16xf32> to vector<2x1xf32>
    %521 = vector.extract_strided_slice %2 {offsets = [4, 0], sizes = [1, 64], strides = [1, 1]} : vector<16x64xf32> to vector<1x64xf32>
    %522 = vector.broadcast %520 : vector<2x1xf32> to vector<2x64xf32>
    %523 = vector.broadcast %521 : vector<1x64xf32> to vector<2x64xf32>
    %524 = arith.mulf %522, %523 : vector<2x64xf32>
    %525 = vector.extract_strided_slice %498 {offsets = [0, 5], sizes = [2, 1], strides = [1, 1]} : vector<2x16xf32> to vector<2x1xf32>
    %526 = vector.extract_strided_slice %2 {offsets = [5, 0], sizes = [1, 64], strides = [1, 1]} : vector<16x64xf32> to vector<1x64xf32>
    %527 = vector.broadcast %525 : vector<2x1xf32> to vector<2x64xf32>
    %528 = vector.broadcast %526 : vector<1x64xf32> to vector<2x64xf32>
    %529 = arith.mulf %527, %528 : vector<2x64xf32>
    %530 = vector.extract_strided_slice %498 {offsets = [0, 6], sizes = [2, 1], strides = [1, 1]} : vector<2x16xf32> to vector<2x1xf32>
    %531 = vector.extract_strided_slice %2 {offsets = [6, 0], sizes = [1, 64], strides = [1, 1]} : vector<16x64xf32> to vector<1x64xf32>
    %532 = vector.broadcast %530 : vector<2x1xf32> to vector<2x64xf32>
    %533 = vector.broadcast %531 : vector<1x64xf32> to vector<2x64xf32>
    %534 = arith.mulf %532, %533 : vector<2x64xf32>
    %535 = vector.extract_strided_slice %498 {offsets = [0, 7], sizes = [2, 1], strides = [1, 1]} : vector<2x16xf32> to vector<2x1xf32>
    %536 = vector.extract_strided_slice %2 {offsets = [7, 0], sizes = [1, 64], strides = [1, 1]} : vector<16x64xf32> to vector<1x64xf32>
    %537 = vector.broadcast %535 : vector<2x1xf32> to vector<2x64xf32>
    %538 = vector.broadcast %536 : vector<1x64xf32> to vector<2x64xf32>
    %539 = arith.mulf %537, %538 : vector<2x64xf32>
    %540 = vector.extract_strided_slice %498 {offsets = [0, 8], sizes = [2, 1], strides = [1, 1]} : vector<2x16xf32> to vector<2x1xf32>
    %541 = vector.extract_strided_slice %2 {offsets = [8, 0], sizes = [1, 64], strides = [1, 1]} : vector<16x64xf32> to vector<1x64xf32>
    %542 = vector.broadcast %540 : vector<2x1xf32> to vector<2x64xf32>
    %543 = vector.broadcast %541 : vector<1x64xf32> to vector<2x64xf32>
    %544 = arith.mulf %542, %543 : vector<2x64xf32>
    %545 = vector.extract_strided_slice %498 {offsets = [0, 9], sizes = [2, 1], strides = [1, 1]} : vector<2x16xf32> to vector<2x1xf32>
    %546 = vector.extract_strided_slice %2 {offsets = [9, 0], sizes = [1, 64], strides = [1, 1]} : vector<16x64xf32> to vector<1x64xf32>
    %547 = vector.broadcast %545 : vector<2x1xf32> to vector<2x64xf32>
    %548 = vector.broadcast %546 : vector<1x64xf32> to vector<2x64xf32>
    %549 = arith.mulf %547, %548 : vector<2x64xf32>
    %550 = vector.extract_strided_slice %498 {offsets = [0, 10], sizes = [2, 1], strides = [1, 1]} : vector<2x16xf32> to vector<2x1xf32>
    %551 = vector.extract_strided_slice %2 {offsets = [10, 0], sizes = [1, 64], strides = [1, 1]} : vector<16x64xf32> to vector<1x64xf32>
    %552 = vector.broadcast %550 : vector<2x1xf32> to vector<2x64xf32>
    %553 = vector.broadcast %551 : vector<1x64xf32> to vector<2x64xf32>
    %554 = arith.mulf %552, %553 : vector<2x64xf32>
    %555 = vector.extract_strided_slice %498 {offsets = [0, 11], sizes = [2, 1], strides = [1, 1]} : vector<2x16xf32> to vector<2x1xf32>
    %556 = vector.extract_strided_slice %2 {offsets = [11, 0], sizes = [1, 64], strides = [1, 1]} : vector<16x64xf32> to vector<1x64xf32>
    %557 = vector.broadcast %555 : vector<2x1xf32> to vector<2x64xf32>
    %558 = vector.broadcast %556 : vector<1x64xf32> to vector<2x64xf32>
    %559 = arith.mulf %557, %558 : vector<2x64xf32>
    %560 = vector.extract_strided_slice %498 {offsets = [0, 12], sizes = [2, 1], strides = [1, 1]} : vector<2x16xf32> to vector<2x1xf32>
    %561 = vector.extract_strided_slice %2 {offsets = [12, 0], sizes = [1, 64], strides = [1, 1]} : vector<16x64xf32> to vector<1x64xf32>
    %562 = vector.broadcast %560 : vector<2x1xf32> to vector<2x64xf32>
    %563 = vector.broadcast %561 : vector<1x64xf32> to vector<2x64xf32>
    %564 = arith.mulf %562, %563 : vector<2x64xf32>
    %565 = vector.extract_strided_slice %498 {offsets = [0, 13], sizes = [2, 1], strides = [1, 1]} : vector<2x16xf32> to vector<2x1xf32>
    %566 = vector.extract_strided_slice %2 {offsets = [13, 0], sizes = [1, 64], strides = [1, 1]} : vector<16x64xf32> to vector<1x64xf32>
    %567 = vector.broadcast %565 : vector<2x1xf32> to vector<2x64xf32>
    %568 = vector.broadcast %566 : vector<1x64xf32> to vector<2x64xf32>
    %569 = arith.mulf %567, %568 : vector<2x64xf32>
    %570 = vector.extract_strided_slice %498 {offsets = [0, 14], sizes = [2, 1], strides = [1, 1]} : vector<2x16xf32> to vector<2x1xf32>
    %571 = vector.extract_strided_slice %2 {offsets = [14, 0], sizes = [1, 64], strides = [1, 1]} : vector<16x64xf32> to vector<1x64xf32>
    %572 = vector.broadcast %570 : vector<2x1xf32> to vector<2x64xf32>
    %573 = vector.broadcast %571 : vector<1x64xf32> to vector<2x64xf32>
    %574 = arith.mulf %572, %573 : vector<2x64xf32>
    %575 = vector.extract_strided_slice %498 {offsets = [0, 15], sizes = [2, 1], strides = [1, 1]} : vector<2x16xf32> to vector<2x1xf32>
    %576 = vector.extract_strided_slice %2 {offsets = [15, 0], sizes = [1, 64], strides = [1, 1]} : vector<16x64xf32> to vector<1x64xf32>
    %577 = vector.broadcast %575 : vector<2x1xf32> to vector<2x64xf32>
    %578 = vector.broadcast %576 : vector<1x64xf32> to vector<2x64xf32>
    %579 = arith.mulf %577, %578 : vector<2x64xf32>
    %580 = arith.addf %504, %509 : vector<2x64xf32>
    %581 = arith.addf %514, %519 : vector<2x64xf32>
    %582 = arith.addf %524, %529 : vector<2x64xf32>
    %583 = arith.addf %534, %539 : vector<2x64xf32>
    %584 = arith.addf %544, %549 : vector<2x64xf32>
    %585 = arith.addf %554, %559 : vector<2x64xf32>
    %586 = arith.addf %564, %569 : vector<2x64xf32>
    %587 = arith.addf %574, %579 : vector<2x64xf32>
    %588 = arith.addf %580, %581 : vector<2x64xf32>
    %589 = arith.addf %582, %583 : vector<2x64xf32>
    %590 = arith.addf %584, %585 : vector<2x64xf32>
    %591 = arith.addf %586, %587 : vector<2x64xf32>
    %592 = arith.addf %588, %589 : vector<2x64xf32>
    %593 = arith.addf %590, %591 : vector<2x64xf32>
    %594 = arith.addf %592, %593 : vector<2x64xf32>
    %595 = arith.addf %499, %594 : vector<2x64xf32>
    %596 = vector.extract_strided_slice %595 {offsets = [0, 0], sizes = [2, 48], strides = [1, 1]} : vector<2x64xf32> to vector<2x48xf32>
    %597 = arith.negf %596 : vector<2x48xf32>
    %598 = math.exp %597 : vector<2x48xf32>
    %cst_12 = arith.constant 1.000000e+00 : f32
    %599 = vector.broadcast %cst_12 : f32 to vector<2x48xf32>
    %600 = arith.addf %599, %598 : vector<2x48xf32>
    %601 = arith.divf %599, %600 : vector<2x48xf32>
    %602 = vector.extract_strided_slice %595 {offsets = [0, 48], sizes = [2, 16], strides = [1, 1]} : vector<2x64xf32> to vector<2x16xf32>
    %603 = math.tanh %602 : vector<2x16xf32>
    %604 = vector.extract_strided_slice %601 {offsets = [0, 0], sizes = [2, 16], strides = [1, 1]} : vector<2x48xf32> to vector<2x16xf32>
    %605 = vector.extract_strided_slice %601 {offsets = [0, 16], sizes = [2, 16], strides = [1, 1]} : vector<2x48xf32> to vector<2x16xf32>
    %606 = vector.extract_strided_slice %601 {offsets = [0, 32], sizes = [2, 16], strides = [1, 1]} : vector<2x48xf32> to vector<2x16xf32>
    %607 = arith.mulf %605, %496 : vector<2x16xf32>
    %608 = arith.mulf %604, %603 : vector<2x16xf32>
    %609 = arith.addf %607, %608 : vector<2x16xf32>
    %610 = math.tanh %609 : vector<2x16xf32>
    %611 = arith.mulf %606, %610 : vector<2x16xf32>
    %612 = vector.extract_strided_slice %28 {offsets = [12, 0], sizes = [2, 64], strides = [1, 1]} : vector<16x64xf32> to vector<2x64xf32>
    %613 = vector.extract_strided_slice %611 {offsets = [0, 0], sizes = [2, 1], strides = [1, 1]} : vector<2x16xf32> to vector<2x1xf32>
    %614 = vector.extract_strided_slice %2 {offsets = [0, 0], sizes = [1, 64], strides = [1, 1]} : vector<16x64xf32> to vector<1x64xf32>
    %615 = vector.broadcast %613 : vector<2x1xf32> to vector<2x64xf32>
    %616 = vector.broadcast %614 : vector<1x64xf32> to vector<2x64xf32>
    %617 = arith.mulf %615, %616 : vector<2x64xf32>
    %618 = vector.extract_strided_slice %611 {offsets = [0, 1], sizes = [2, 1], strides = [1, 1]} : vector<2x16xf32> to vector<2x1xf32>
    %619 = vector.extract_strided_slice %2 {offsets = [1, 0], sizes = [1, 64], strides = [1, 1]} : vector<16x64xf32> to vector<1x64xf32>
    %620 = vector.broadcast %618 : vector<2x1xf32> to vector<2x64xf32>
    %621 = vector.broadcast %619 : vector<1x64xf32> to vector<2x64xf32>
    %622 = arith.mulf %620, %621 : vector<2x64xf32>
    %623 = vector.extract_strided_slice %611 {offsets = [0, 2], sizes = [2, 1], strides = [1, 1]} : vector<2x16xf32> to vector<2x1xf32>
    %624 = vector.extract_strided_slice %2 {offsets = [2, 0], sizes = [1, 64], strides = [1, 1]} : vector<16x64xf32> to vector<1x64xf32>
    %625 = vector.broadcast %623 : vector<2x1xf32> to vector<2x64xf32>
    %626 = vector.broadcast %624 : vector<1x64xf32> to vector<2x64xf32>
    %627 = arith.mulf %625, %626 : vector<2x64xf32>
    %628 = vector.extract_strided_slice %611 {offsets = [0, 3], sizes = [2, 1], strides = [1, 1]} : vector<2x16xf32> to vector<2x1xf32>
    %629 = vector.extract_strided_slice %2 {offsets = [3, 0], sizes = [1, 64], strides = [1, 1]} : vector<16x64xf32> to vector<1x64xf32>
    %630 = vector.broadcast %628 : vector<2x1xf32> to vector<2x64xf32>
    %631 = vector.broadcast %629 : vector<1x64xf32> to vector<2x64xf32>
    %632 = arith.mulf %630, %631 : vector<2x64xf32>
    %633 = vector.extract_strided_slice %611 {offsets = [0, 4], sizes = [2, 1], strides = [1, 1]} : vector<2x16xf32> to vector<2x1xf32>
    %634 = vector.extract_strided_slice %2 {offsets = [4, 0], sizes = [1, 64], strides = [1, 1]} : vector<16x64xf32> to vector<1x64xf32>
    %635 = vector.broadcast %633 : vector<2x1xf32> to vector<2x64xf32>
    %636 = vector.broadcast %634 : vector<1x64xf32> to vector<2x64xf32>
    %637 = arith.mulf %635, %636 : vector<2x64xf32>
    %638 = vector.extract_strided_slice %611 {offsets = [0, 5], sizes = [2, 1], strides = [1, 1]} : vector<2x16xf32> to vector<2x1xf32>
    %639 = vector.extract_strided_slice %2 {offsets = [5, 0], sizes = [1, 64], strides = [1, 1]} : vector<16x64xf32> to vector<1x64xf32>
    %640 = vector.broadcast %638 : vector<2x1xf32> to vector<2x64xf32>
    %641 = vector.broadcast %639 : vector<1x64xf32> to vector<2x64xf32>
    %642 = arith.mulf %640, %641 : vector<2x64xf32>
    %643 = vector.extract_strided_slice %611 {offsets = [0, 6], sizes = [2, 1], strides = [1, 1]} : vector<2x16xf32> to vector<2x1xf32>
    %644 = vector.extract_strided_slice %2 {offsets = [6, 0], sizes = [1, 64], strides = [1, 1]} : vector<16x64xf32> to vector<1x64xf32>
    %645 = vector.broadcast %643 : vector<2x1xf32> to vector<2x64xf32>
    %646 = vector.broadcast %644 : vector<1x64xf32> to vector<2x64xf32>
    %647 = arith.mulf %645, %646 : vector<2x64xf32>
    %648 = vector.extract_strided_slice %611 {offsets = [0, 7], sizes = [2, 1], strides = [1, 1]} : vector<2x16xf32> to vector<2x1xf32>
    %649 = vector.extract_strided_slice %2 {offsets = [7, 0], sizes = [1, 64], strides = [1, 1]} : vector<16x64xf32> to vector<1x64xf32>
    %650 = vector.broadcast %648 : vector<2x1xf32> to vector<2x64xf32>
    %651 = vector.broadcast %649 : vector<1x64xf32> to vector<2x64xf32>
    %652 = arith.mulf %650, %651 : vector<2x64xf32>
    %653 = vector.extract_strided_slice %611 {offsets = [0, 8], sizes = [2, 1], strides = [1, 1]} : vector<2x16xf32> to vector<2x1xf32>
    %654 = vector.extract_strided_slice %2 {offsets = [8, 0], sizes = [1, 64], strides = [1, 1]} : vector<16x64xf32> to vector<1x64xf32>
    %655 = vector.broadcast %653 : vector<2x1xf32> to vector<2x64xf32>
    %656 = vector.broadcast %654 : vector<1x64xf32> to vector<2x64xf32>
    %657 = arith.mulf %655, %656 : vector<2x64xf32>
    %658 = vector.extract_strided_slice %611 {offsets = [0, 9], sizes = [2, 1], strides = [1, 1]} : vector<2x16xf32> to vector<2x1xf32>
    %659 = vector.extract_strided_slice %2 {offsets = [9, 0], sizes = [1, 64], strides = [1, 1]} : vector<16x64xf32> to vector<1x64xf32>
    %660 = vector.broadcast %658 : vector<2x1xf32> to vector<2x64xf32>
    %661 = vector.broadcast %659 : vector<1x64xf32> to vector<2x64xf32>
    %662 = arith.mulf %660, %661 : vector<2x64xf32>
    %663 = vector.extract_strided_slice %611 {offsets = [0, 10], sizes = [2, 1], strides = [1, 1]} : vector<2x16xf32> to vector<2x1xf32>
    %664 = vector.extract_strided_slice %2 {offsets = [10, 0], sizes = [1, 64], strides = [1, 1]} : vector<16x64xf32> to vector<1x64xf32>
    %665 = vector.broadcast %663 : vector<2x1xf32> to vector<2x64xf32>
    %666 = vector.broadcast %664 : vector<1x64xf32> to vector<2x64xf32>
    %667 = arith.mulf %665, %666 : vector<2x64xf32>
    %668 = vector.extract_strided_slice %611 {offsets = [0, 11], sizes = [2, 1], strides = [1, 1]} : vector<2x16xf32> to vector<2x1xf32>
    %669 = vector.extract_strided_slice %2 {offsets = [11, 0], sizes = [1, 64], strides = [1, 1]} : vector<16x64xf32> to vector<1x64xf32>
    %670 = vector.broadcast %668 : vector<2x1xf32> to vector<2x64xf32>
    %671 = vector.broadcast %669 : vector<1x64xf32> to vector<2x64xf32>
    %672 = arith.mulf %670, %671 : vector<2x64xf32>
    %673 = vector.extract_strided_slice %611 {offsets = [0, 12], sizes = [2, 1], strides = [1, 1]} : vector<2x16xf32> to vector<2x1xf32>
    %674 = vector.extract_strided_slice %2 {offsets = [12, 0], sizes = [1, 64], strides = [1, 1]} : vector<16x64xf32> to vector<1x64xf32>
    %675 = vector.broadcast %673 : vector<2x1xf32> to vector<2x64xf32>
    %676 = vector.broadcast %674 : vector<1x64xf32> to vector<2x64xf32>
    %677 = arith.mulf %675, %676 : vector<2x64xf32>
    %678 = vector.extract_strided_slice %611 {offsets = [0, 13], sizes = [2, 1], strides = [1, 1]} : vector<2x16xf32> to vector<2x1xf32>
    %679 = vector.extract_strided_slice %2 {offsets = [13, 0], sizes = [1, 64], strides = [1, 1]} : vector<16x64xf32> to vector<1x64xf32>
    %680 = vector.broadcast %678 : vector<2x1xf32> to vector<2x64xf32>
    %681 = vector.broadcast %679 : vector<1x64xf32> to vector<2x64xf32>
    %682 = arith.mulf %680, %681 : vector<2x64xf32>
    %683 = vector.extract_strided_slice %611 {offsets = [0, 14], sizes = [2, 1], strides = [1, 1]} : vector<2x16xf32> to vector<2x1xf32>
    %684 = vector.extract_strided_slice %2 {offsets = [14, 0], sizes = [1, 64], strides = [1, 1]} : vector<16x64xf32> to vector<1x64xf32>
    %685 = vector.broadcast %683 : vector<2x1xf32> to vector<2x64xf32>
    %686 = vector.broadcast %684 : vector<1x64xf32> to vector<2x64xf32>
    %687 = arith.mulf %685, %686 : vector<2x64xf32>
    %688 = vector.extract_strided_slice %611 {offsets = [0, 15], sizes = [2, 1], strides = [1, 1]} : vector<2x16xf32> to vector<2x1xf32>
    %689 = vector.extract_strided_slice %2 {offsets = [15, 0], sizes = [1, 64], strides = [1, 1]} : vector<16x64xf32> to vector<1x64xf32>
    %690 = vector.broadcast %688 : vector<2x1xf32> to vector<2x64xf32>
    %691 = vector.broadcast %689 : vector<1x64xf32> to vector<2x64xf32>
    %692 = arith.mulf %690, %691 : vector<2x64xf32>
    %693 = arith.addf %617, %622 : vector<2x64xf32>
    %694 = arith.addf %627, %632 : vector<2x64xf32>
    %695 = arith.addf %637, %642 : vector<2x64xf32>
    %696 = arith.addf %647, %652 : vector<2x64xf32>
    %697 = arith.addf %657, %662 : vector<2x64xf32>
    %698 = arith.addf %667, %672 : vector<2x64xf32>
    %699 = arith.addf %677, %682 : vector<2x64xf32>
    %700 = arith.addf %687, %692 : vector<2x64xf32>
    %701 = arith.addf %693, %694 : vector<2x64xf32>
    %702 = arith.addf %695, %696 : vector<2x64xf32>
    %703 = arith.addf %697, %698 : vector<2x64xf32>
    %704 = arith.addf %699, %700 : vector<2x64xf32>
    %705 = arith.addf %701, %702 : vector<2x64xf32>
    %706 = arith.addf %703, %704 : vector<2x64xf32>
    %707 = arith.addf %705, %706 : vector<2x64xf32>
    %708 = arith.addf %612, %707 : vector<2x64xf32>
    %709 = vector.extract_strided_slice %708 {offsets = [0, 0], sizes = [2, 48], strides = [1, 1]} : vector<2x64xf32> to vector<2x48xf32>
    %710 = arith.negf %709 : vector<2x48xf32>
    %711 = math.exp %710 : vector<2x48xf32>
    %cst_13 = arith.constant 1.000000e+00 : f32
    %712 = vector.broadcast %cst_13 : f32 to vector<2x48xf32>
    %713 = arith.addf %712, %711 : vector<2x48xf32>
    %714 = arith.divf %712, %713 : vector<2x48xf32>
    %715 = vector.extract_strided_slice %708 {offsets = [0, 48], sizes = [2, 16], strides = [1, 1]} : vector<2x64xf32> to vector<2x16xf32>
    %716 = math.tanh %715 : vector<2x16xf32>
    %717 = vector.extract_strided_slice %714 {offsets = [0, 0], sizes = [2, 16], strides = [1, 1]} : vector<2x48xf32> to vector<2x16xf32>
    %718 = vector.extract_strided_slice %714 {offsets = [0, 16], sizes = [2, 16], strides = [1, 1]} : vector<2x48xf32> to vector<2x16xf32>
    %719 = vector.extract_strided_slice %714 {offsets = [0, 32], sizes = [2, 16], strides = [1, 1]} : vector<2x48xf32> to vector<2x16xf32>
    %720 = arith.mulf %718, %609 : vector<2x16xf32>
    %721 = arith.mulf %717, %716 : vector<2x16xf32>
    %722 = arith.addf %720, %721 : vector<2x16xf32>
    %723 = math.tanh %722 : vector<2x16xf32>
    %724 = arith.mulf %719, %723 : vector<2x16xf32>
    %725 = vector.extract_strided_slice %28 {offsets = [14, 0], sizes = [2, 64], strides = [1, 1]} : vector<16x64xf32> to vector<2x64xf32>
    %726 = vector.extract_strided_slice %724 {offsets = [0, 0], sizes = [2, 1], strides = [1, 1]} : vector<2x16xf32> to vector<2x1xf32>
    %727 = vector.extract_strided_slice %2 {offsets = [0, 0], sizes = [1, 64], strides = [1, 1]} : vector<16x64xf32> to vector<1x64xf32>
    %728 = vector.broadcast %726 : vector<2x1xf32> to vector<2x64xf32>
    %729 = vector.broadcast %727 : vector<1x64xf32> to vector<2x64xf32>
    %730 = arith.mulf %728, %729 : vector<2x64xf32>
    %731 = vector.extract_strided_slice %724 {offsets = [0, 1], sizes = [2, 1], strides = [1, 1]} : vector<2x16xf32> to vector<2x1xf32>
    %732 = vector.extract_strided_slice %2 {offsets = [1, 0], sizes = [1, 64], strides = [1, 1]} : vector<16x64xf32> to vector<1x64xf32>
    %733 = vector.broadcast %731 : vector<2x1xf32> to vector<2x64xf32>
    %734 = vector.broadcast %732 : vector<1x64xf32> to vector<2x64xf32>
    %735 = arith.mulf %733, %734 : vector<2x64xf32>
    %736 = vector.extract_strided_slice %724 {offsets = [0, 2], sizes = [2, 1], strides = [1, 1]} : vector<2x16xf32> to vector<2x1xf32>
    %737 = vector.extract_strided_slice %2 {offsets = [2, 0], sizes = [1, 64], strides = [1, 1]} : vector<16x64xf32> to vector<1x64xf32>
    %738 = vector.broadcast %736 : vector<2x1xf32> to vector<2x64xf32>
    %739 = vector.broadcast %737 : vector<1x64xf32> to vector<2x64xf32>
    %740 = arith.mulf %738, %739 : vector<2x64xf32>
    %741 = vector.extract_strided_slice %724 {offsets = [0, 3], sizes = [2, 1], strides = [1, 1]} : vector<2x16xf32> to vector<2x1xf32>
    %742 = vector.extract_strided_slice %2 {offsets = [3, 0], sizes = [1, 64], strides = [1, 1]} : vector<16x64xf32> to vector<1x64xf32>
    %743 = vector.broadcast %741 : vector<2x1xf32> to vector<2x64xf32>
    %744 = vector.broadcast %742 : vector<1x64xf32> to vector<2x64xf32>
    %745 = arith.mulf %743, %744 : vector<2x64xf32>
    %746 = vector.extract_strided_slice %724 {offsets = [0, 4], sizes = [2, 1], strides = [1, 1]} : vector<2x16xf32> to vector<2x1xf32>
    %747 = vector.extract_strided_slice %2 {offsets = [4, 0], sizes = [1, 64], strides = [1, 1]} : vector<16x64xf32> to vector<1x64xf32>
    %748 = vector.broadcast %746 : vector<2x1xf32> to vector<2x64xf32>
    %749 = vector.broadcast %747 : vector<1x64xf32> to vector<2x64xf32>
    %750 = arith.mulf %748, %749 : vector<2x64xf32>
    %751 = vector.extract_strided_slice %724 {offsets = [0, 5], sizes = [2, 1], strides = [1, 1]} : vector<2x16xf32> to vector<2x1xf32>
    %752 = vector.extract_strided_slice %2 {offsets = [5, 0], sizes = [1, 64], strides = [1, 1]} : vector<16x64xf32> to vector<1x64xf32>
    %753 = vector.broadcast %751 : vector<2x1xf32> to vector<2x64xf32>
    %754 = vector.broadcast %752 : vector<1x64xf32> to vector<2x64xf32>
    %755 = arith.mulf %753, %754 : vector<2x64xf32>
    %756 = vector.extract_strided_slice %724 {offsets = [0, 6], sizes = [2, 1], strides = [1, 1]} : vector<2x16xf32> to vector<2x1xf32>
    %757 = vector.extract_strided_slice %2 {offsets = [6, 0], sizes = [1, 64], strides = [1, 1]} : vector<16x64xf32> to vector<1x64xf32>
    %758 = vector.broadcast %756 : vector<2x1xf32> to vector<2x64xf32>
    %759 = vector.broadcast %757 : vector<1x64xf32> to vector<2x64xf32>
    %760 = arith.mulf %758, %759 : vector<2x64xf32>
    %761 = vector.extract_strided_slice %724 {offsets = [0, 7], sizes = [2, 1], strides = [1, 1]} : vector<2x16xf32> to vector<2x1xf32>
    %762 = vector.extract_strided_slice %2 {offsets = [7, 0], sizes = [1, 64], strides = [1, 1]} : vector<16x64xf32> to vector<1x64xf32>
    %763 = vector.broadcast %761 : vector<2x1xf32> to vector<2x64xf32>
    %764 = vector.broadcast %762 : vector<1x64xf32> to vector<2x64xf32>
    %765 = arith.mulf %763, %764 : vector<2x64xf32>
    %766 = vector.extract_strided_slice %724 {offsets = [0, 8], sizes = [2, 1], strides = [1, 1]} : vector<2x16xf32> to vector<2x1xf32>
    %767 = vector.extract_strided_slice %2 {offsets = [8, 0], sizes = [1, 64], strides = [1, 1]} : vector<16x64xf32> to vector<1x64xf32>
    %768 = vector.broadcast %766 : vector<2x1xf32> to vector<2x64xf32>
    %769 = vector.broadcast %767 : vector<1x64xf32> to vector<2x64xf32>
    %770 = arith.mulf %768, %769 : vector<2x64xf32>
    %771 = vector.extract_strided_slice %724 {offsets = [0, 9], sizes = [2, 1], strides = [1, 1]} : vector<2x16xf32> to vector<2x1xf32>
    %772 = vector.extract_strided_slice %2 {offsets = [9, 0], sizes = [1, 64], strides = [1, 1]} : vector<16x64xf32> to vector<1x64xf32>
    %773 = vector.broadcast %771 : vector<2x1xf32> to vector<2x64xf32>
    %774 = vector.broadcast %772 : vector<1x64xf32> to vector<2x64xf32>
    %775 = arith.mulf %773, %774 : vector<2x64xf32>
    %776 = vector.extract_strided_slice %724 {offsets = [0, 10], sizes = [2, 1], strides = [1, 1]} : vector<2x16xf32> to vector<2x1xf32>
    %777 = vector.extract_strided_slice %2 {offsets = [10, 0], sizes = [1, 64], strides = [1, 1]} : vector<16x64xf32> to vector<1x64xf32>
    %778 = vector.broadcast %776 : vector<2x1xf32> to vector<2x64xf32>
    %779 = vector.broadcast %777 : vector<1x64xf32> to vector<2x64xf32>
    %780 = arith.mulf %778, %779 : vector<2x64xf32>
    %781 = vector.extract_strided_slice %724 {offsets = [0, 11], sizes = [2, 1], strides = [1, 1]} : vector<2x16xf32> to vector<2x1xf32>
    %782 = vector.extract_strided_slice %2 {offsets = [11, 0], sizes = [1, 64], strides = [1, 1]} : vector<16x64xf32> to vector<1x64xf32>
    %783 = vector.broadcast %781 : vector<2x1xf32> to vector<2x64xf32>
    %784 = vector.broadcast %782 : vector<1x64xf32> to vector<2x64xf32>
    %785 = arith.mulf %783, %784 : vector<2x64xf32>
    %786 = vector.extract_strided_slice %724 {offsets = [0, 12], sizes = [2, 1], strides = [1, 1]} : vector<2x16xf32> to vector<2x1xf32>
    %787 = vector.extract_strided_slice %2 {offsets = [12, 0], sizes = [1, 64], strides = [1, 1]} : vector<16x64xf32> to vector<1x64xf32>
    %788 = vector.broadcast %786 : vector<2x1xf32> to vector<2x64xf32>
    %789 = vector.broadcast %787 : vector<1x64xf32> to vector<2x64xf32>
    %790 = arith.mulf %788, %789 : vector<2x64xf32>
    %791 = vector.extract_strided_slice %724 {offsets = [0, 13], sizes = [2, 1], strides = [1, 1]} : vector<2x16xf32> to vector<2x1xf32>
    %792 = vector.extract_strided_slice %2 {offsets = [13, 0], sizes = [1, 64], strides = [1, 1]} : vector<16x64xf32> to vector<1x64xf32>
    %793 = vector.broadcast %791 : vector<2x1xf32> to vector<2x64xf32>
    %794 = vector.broadcast %792 : vector<1x64xf32> to vector<2x64xf32>
    %795 = arith.mulf %793, %794 : vector<2x64xf32>
    %796 = vector.extract_strided_slice %724 {offsets = [0, 14], sizes = [2, 1], strides = [1, 1]} : vector<2x16xf32> to vector<2x1xf32>
    %797 = vector.extract_strided_slice %2 {offsets = [14, 0], sizes = [1, 64], strides = [1, 1]} : vector<16x64xf32> to vector<1x64xf32>
    %798 = vector.broadcast %796 : vector<2x1xf32> to vector<2x64xf32>
    %799 = vector.broadcast %797 : vector<1x64xf32> to vector<2x64xf32>
    %800 = arith.mulf %798, %799 : vector<2x64xf32>
    %801 = vector.extract_strided_slice %724 {offsets = [0, 15], sizes = [2, 1], strides = [1, 1]} : vector<2x16xf32> to vector<2x1xf32>
    %802 = vector.extract_strided_slice %2 {offsets = [15, 0], sizes = [1, 64], strides = [1, 1]} : vector<16x64xf32> to vector<1x64xf32>
    %803 = vector.broadcast %801 : vector<2x1xf32> to vector<2x64xf32>
    %804 = vector.broadcast %802 : vector<1x64xf32> to vector<2x64xf32>
    %805 = arith.mulf %803, %804 : vector<2x64xf32>
    %806 = arith.addf %730, %735 : vector<2x64xf32>
    %807 = arith.addf %740, %745 : vector<2x64xf32>
    %808 = arith.addf %750, %755 : vector<2x64xf32>
    %809 = arith.addf %760, %765 : vector<2x64xf32>
    %810 = arith.addf %770, %775 : vector<2x64xf32>
    %811 = arith.addf %780, %785 : vector<2x64xf32>
    %812 = arith.addf %790, %795 : vector<2x64xf32>
    %813 = arith.addf %800, %805 : vector<2x64xf32>
    %814 = arith.addf %806, %807 : vector<2x64xf32>
    %815 = arith.addf %808, %809 : vector<2x64xf32>
    %816 = arith.addf %810, %811 : vector<2x64xf32>
    %817 = arith.addf %812, %813 : vector<2x64xf32>
    %818 = arith.addf %814, %815 : vector<2x64xf32>
    %819 = arith.addf %816, %817 : vector<2x64xf32>
    %820 = arith.addf %818, %819 : vector<2x64xf32>
    %821 = arith.addf %725, %820 : vector<2x64xf32>
    %822 = vector.extract_strided_slice %821 {offsets = [0, 0], sizes = [2, 48], strides = [1, 1]} : vector<2x64xf32> to vector<2x48xf32>
    %823 = arith.negf %822 : vector<2x48xf32>
    %824 = math.exp %823 : vector<2x48xf32>
    %cst_14 = arith.constant 1.000000e+00 : f32
    %825 = vector.broadcast %cst_14 : f32 to vector<2x48xf32>
    %826 = arith.addf %825, %824 : vector<2x48xf32>
    %827 = arith.divf %825, %826 : vector<2x48xf32>
    %828 = vector.extract_strided_slice %821 {offsets = [0, 48], sizes = [2, 16], strides = [1, 1]} : vector<2x64xf32> to vector<2x16xf32>
    %829 = math.tanh %828 : vector<2x16xf32>
    %830 = vector.extract_strided_slice %827 {offsets = [0, 0], sizes = [2, 16], strides = [1, 1]} : vector<2x48xf32> to vector<2x16xf32>
    %831 = vector.extract_strided_slice %827 {offsets = [0, 16], sizes = [2, 16], strides = [1, 1]} : vector<2x48xf32> to vector<2x16xf32>
    %832 = vector.extract_strided_slice %827 {offsets = [0, 32], sizes = [2, 16], strides = [1, 1]} : vector<2x48xf32> to vector<2x16xf32>
    %833 = arith.mulf %831, %722 : vector<2x16xf32>
    %834 = arith.mulf %830, %829 : vector<2x16xf32>
    %835 = arith.addf %833, %834 : vector<2x16xf32>
    %836 = math.tanh %835 : vector<2x16xf32>
    %837 = arith.mulf %832, %836 : vector<2x16xf32>
    %c0_15 = arith.constant 0 : index
    %c0_16 = arith.constant 0 : index
    %838 = vector.load %arg4[%c0_15, %c0_16] : memref<1x16xf32, #tpu.memory_space<vmem>>, vector<1x16xf32>
    %839 = vector.broadcast %838 : vector<1x16xf32> to vector<2x16xf32>
    %840 = arith.mulf %837, %839 : vector<2x16xf32>
    %cst_17 = arith.constant dense<0.000000e+00> : vector<2xf32>
    %841 = vector.multi_reduction <add>, %840, %cst_17 [1] : vector<2x16xf32> to vector<2xf32>
    %842 = vector.shape_cast %841 : vector<2xf32> to vector<2x1xf32>
    %c0_18 = arith.constant 0 : index
    %c0_19 = arith.constant 0 : index
    %843 = vector.load %arg5[%c0_18, %c0_19] : memref<1x1xf32, #tpu.memory_space<vmem>>, vector<1x1xf32>
    %844 = vector.broadcast %843 : vector<1x1xf32> to vector<2x1xf32>
    %845 = arith.addf %842, %844 : vector<2x1xf32>
    %846 = arith.negf %845 : vector<2x1xf32>
    %847 = math.exp %846 : vector<2x1xf32>
    %cst_20 = arith.constant 1.000000e+00 : f32
    %848 = vector.broadcast %cst_20 : f32 to vector<2x1xf32>
    %849 = arith.addf %848, %847 : vector<2x1xf32>
    %850 = arith.divf %848, %849 : vector<2x1xf32>
    %c0_21 = arith.constant 0 : index
    %c0_22 = arith.constant 0 : index
    %851 = vector.load %arg6[%c0_21, %c0_22] : memref<2x1xf32, #tpu.memory_space<vmem>>, vector<2x1xf32>
    tpu.vector_store %arg6[%c0_21, %c0_22], %850 {strides = array<i32>} : memref<2x1xf32, #tpu.memory_space<vmem>>, vector<2x1xf32>,
    return
  }
}

</mosaic_0001>

<bundles_post_ra>
// kernel: tpu_custom_call.1
= control target key start
LH: loop header
LB: loop body
LE: loop exit
PB: predicated region body
PF: predicated region fallthrough
CT: control target
= control target key end

     0   :  { %v1816_v0 = vmov 2   ;;  %v1819_v1 = vmov 0   ;;  %v1817_v3 = vmov 3   ;;  %v1818_v4 = vmov 1   ;;  %s1347_s26 = smov 80   ;;  %s1365_s9 = smov 32   ;;  %s1809_s0 = inlined_call_operand.vmem [shape: f32[16,4], index: 0, kind: input, shape index: {}]   ;;  %s1810_s1 = inlined_call_operand.vmem [shape: f32[4,64], index: 1, kind: input, shape index: {}]   ;;  %s1811_s3 = inlined_call_operand.vmem [shape: f32[1,64], index: 3, kind: input, shape index: {}]   ;;  %s1812_s2 = inlined_call_operand.vmem [shape: f32[16,64], index: 2, kind: input, shape index: {}]   ;;  %s1813_s4 = inlined_call_operand.vmem [shape: f32[1,16], index: 4, kind: input, shape index: {}]   ;;  %s1814_s5 = inlined_call_operand.<no memory space> [shape: f32[1,1], index: 5, kind: input, shape index: {}]   ;;  %s1815_s6 = inlined_call_operand.vmem [shape: f32[2,1], index: 6, kind: output, shape index: {}]  }
   0x1   :  { %1156 = vset.pattern.permute.xlu1 %v1816_v0  ;;  %1154 = vset.pattern.permute.xlu0 %v1819_v1  ;;  %v25_v2 = vld [vmem:[%s1809_s0] sm:$0xff]  ;;  %v41_v5 = vlaneseq  ;;  %v1830_v39 = vmov 33   ;;  %v1820_v40 = vmov 32   ;;  %v1848_v44 = vmov 34  }
   0x2   :  { %62 = vperm.xlu1 %1156, %v25_v2   ;;  %33 = vperm.xlu0 %1154, %v25_v2   ;;  %v27_v11 = vld [vmem:[%s1810_s1] sm:$0xf]  ;;  %v1844_v45 = vmov 35   ;;  %v1850_v46 = vmov 36   ;;  %v1836_v47 = vmov 38   ;;  %v1840_v48 = vmov 37  }
   0x3   :  { %v1409_v6 = vshrl.u32 %v41_v5, 7  ;;  %v1445_v26 = vld [vmem:[%s1811_s3] ss:$0 sm:$0xff]  ;;  %s1348_s3 = smov 16   ;;  %v1832_v49 = vmov 41   ;;  %v1846_v50 = vmov 39  }
   0x4   :  { %v1826_v51 = vmov 44   ;;  %v1834_v52 = vmov 40   ;;  %v1822_v53 = vmov 47   ;;  %v1842_v54 = vmov 42  }
   0x5   :  { %v1412_v7 = vsub.s32 2, %v1409_v6  ;;  %v1415_v8 = vsub.s32 0, %v1409_v6  ;;  %v1418_v9 = vsub.s32 3, %v1409_v6  ;;  %v1421_v10 = vsub.s32 1, %v1409_v6 }
   0x6   :  { %1157 = vset.pattern.permute.xlu1 %v1817_v3  ;;  %1155 = vset.pattern.permute.xlu0 %v1818_v4  ;;  %v1828_v55 = vmov 43   ;;  %v1838_v56 = vmov 45   ;;  %v1824_v57 = vmov 46   ;;  %vm1094_vm0 = vcmask 130054  }
   0x7   :  { %76 = vperm.xlu1 %1157, %v25_v2   ;;  %48 = vperm.xlu0 %1155, %v25_v2   ;;  %v1427_v14 = vrot.slane %v27_v11, %v1412_v7  ;;  %v1430_v15 = vrot.slane %v27_v11, %v1415_v8  ;;  %v1433_v16 = vrot.slane %v27_v11, %v1418_v9  ;;  %vm1112_vm1 = vcmask 7174  }
   0x8   :  { %v1436_v17 = vrot.slane %v27_v11, %v1421_v10 }
   0xb   :  { %1159 = vset.pattern.permute.xlu1 %v1830_v39  ;;  %1158 = vset.pattern.permute.xlu0 %v1820_v40 }
  0x7d   :  { %v63_v12 = vpop.permute.xlu1 %62  ;;  %v34_v13 = vpop.permute.xlu0 %33 }
  0x7e   :  { %v73_v20 = vmul.f32 %v1427_v14, %v63_v12  ;;  %v45_v21 = vmul.f32 %v1430_v15, %v34_v13 }
  0x82   :  { %v77_v18 = vpop.permute.xlu1 %76  ;;  %v49_v19 = vpop.permute.xlu0 %48 }
  0x83   :  { %v87_v22 = vmul.f32 %v1433_v16, %v77_v18  ;;  %v59_v23 = vmul.f32 %v1436_v17, %v49_v19  ;;  %v197_v18 = vsub.s32 7, %v1409_v6  ;;  %v179_v19 = vsub.s32 5, %v1409_v6 }
  0x85   :  { %v91_v24 = vadd.f32 %v87_v22, %v73_v20  ;;  %v89_v25 = vadd.f32 %v59_v23, %v45_v21  ;;  %v188_v20 = vsub.s32 6, %v1409_v6  ;;  %v28_v21 = vld [vmem:[%s1812_s2] sm:$0xff]  ;;  %v170_v22 = vsub.s32 4, %v1409_v6 }
  0x87   :  { %v93_v27 = vadd.f32 %v91_v24, %v89_v25  ;;  %v1483_v24 = vrot.slane %v28_v21, %v197_v18  ;;  %v29_v25 = vld [vmem:[%s1812_s2 + $0x8] sm:$0xff]  ;;  %v1499_v6 = vrot.slane %v28_v21, %v188_v20 }
  0x88   :  { %v1524_v4 = vrot.slane %v29_v25, %v170_v22  ;;  %v1530_v1 = vrot.slane %v29_v25, %v188_v20 }
  0x89   :  { %v1448_v28 = vadd.f32 %v1445_v26, %v93_v27  ;;  %1858 = vst [vmem:[#allocation3_spill] sm:$0xff] %v1483_v24  ;;  %v1489_v27 = vrot.slane %v28_v21, %v1412_v7 }
  0x8b   :  { %1275 = vtanh.f32 %v1448_v28  ;;  %v1119_v30 = vmul.f32 -1.442695, %v1448_v28  ;;  %1859 = vst [vmem:[#allocation4_spill] sm:$0xff] %v1489_v27 }
  0x8d   :  { %1277 = vpow2.f32 %v1119_v30  ;;  %v1494_v30 = vrot.slane %v28_v21, %v179_v19 }
  0x98   :  { %v1276_v29 = vpop.eup %1275 }
  0x99   :  { %112 = vrot.lane.b32.xlu1 %v1276_v29, %s1347_s26  ;;  %v1492_v29 = vrot.slane %v28_v21, %v1418_v9 }
  0x9a   :  { %v1278_v31 = vpop.eup %1277 }
  0x9b   :  { %v106_v32 = vadd.f32 1.0, %v1278_v31 }
  0x9d   :  { %1279 = vrcp.f32 %v106_v32  ;;  %v1497_v32 = vrot.slane %v29_v25, %v1418_v9 }
  0xaa   :  { %v1280_v33 = vpop.eup %1279 }
  0xab   :  { %v110_v36 = vmul.f32 0.0, %v1280_v33 }
 0x10b   :  { %v113_v34 = vpop.permute.xlu1 %112 }
 0x10c   :  { %v115_v35 = vmul.f32 %v1280_v33, %v113_v34  ;;  %v1505_v34 = vrot.slane %v28_v21, %v1415_v8 }
 0x10e   :  { %117 = vrot.lane.b32.xlu0 %v115_v35, %s1348_s3  ;;  %1860 = vst [vmem:[#allocation5_spill] sm:$0xff] %v1505_v34  ;;  %v1508_v35 = vrot.slane %v28_v21, %v1421_v10 }
 0x180   :  { %v118_v37 = vpop.permute.xlu0 %117 }
 0x181   :  { %v1454_v38 = vadd.f32 %v118_v37, %v110_v36  ;;  %v1510_v36 = vrot.slane %v28_v21, %v170_v22  ;;  %v1513_v37 = vrot.slane %v29_v25, %v1415_v8  ;;  %v1527_v8 = vrot.slane %v29_v25, %v197_v18 }
 0x183   :  { %1281 = vtanh.f32 %v1454_v38 }
 0x190   :  { %v1282_v41 = vpop.eup %1281 }
 0x191   :  { %123 = vrot.lane.b32.xlu1 %v1282_v41, %s1348_s3  ;;  %v1516_v41 = vrot.slane %v29_v25, %v1421_v10 }
 0x203   :  { %v124_v42 = vpop.permute.xlu1 %123 }
 0x204   :  { %v126_v43 = vmul.f32 %v1280_v33, %v124_v42  ;;  %v1502_v33 = vrot.slane %v29_v25, %v1412_v7  ;;  %v1519_v42 = vrot.slane %v29_v25, %v179_v19 }
 0x206   :  { %138 = vperm.xlu1 %1159, %v126_v43   ;;  %129 = vperm.xlu0 %1158, %v126_v43  }
 0x20a   :  { %1160 = vset.pattern.permute.xlu1 %v1848_v44  ;;  %1161 = vset.pattern.permute.xlu0 %v1844_v45 }
 0x20b   :  { %147 = vperm.xlu1 %1160, %v126_v43   ;;  %156 = vperm.xlu0 %1161, %v126_v43  }
 0x20f   :  { %1162 = vset.pattern.permute.xlu1 %v1850_v46  ;;  %1164 = vset.pattern.permute.xlu0 %v1836_v47 }
 0x210   :  { %165 = vperm.xlu1 %1162, %v126_v43   ;;  %183 = vperm.xlu0 %1164, %v126_v43  }
 0x214   :  { %1163 = vset.pattern.permute.xlu1 %v1840_v48  ;;  %1167 = vset.pattern.permute.xlu0 %v1832_v49 }
 0x215   :  { %174 = vperm.xlu1 %1163, %v126_v43   ;;  %210 = vperm.xlu0 %1167, %v126_v43  }
 0x219   :  { %1165 = vset.pattern.permute.xlu1 %v1846_v50  ;;  %1170 = vset.pattern.permute.xlu0 %v1826_v51 }
 0x21a   :  { %192 = vperm.xlu1 %1165, %v126_v43   ;;  %237 = vperm.xlu0 %1170, %v126_v43  }
 0x21e   :  { %1166 = vset.pattern.permute.xlu1 %v1834_v52  ;;  %1173 = vset.pattern.permute.xlu0 %v1822_v53 }
 0x21f   :  { %201 = vperm.xlu1 %1166, %v126_v43   ;;  %264 = vperm.xlu0 %1173, %v126_v43  }
 0x223   :  { %1168 = vset.pattern.permute.xlu1 %v1842_v54  ;;  %1175 = vset.pattern.permute.xlu0 %v1830_v39 }
 0x224   :  { %219 = vperm.xlu1 %1168, %v126_v43  }
 0x228   :  { %1169 = vset.pattern.permute.xlu1 %v1828_v55 }
 0x229   :  { %228 = vperm.xlu1 %1169, %v126_v43  }
 0x22d   :  { %1171 = vset.pattern.permute.xlu1 %v1838_v56 }
 0x22e   :  { %246 = vperm.xlu1 %1171, %v126_v43  }
 0x232   :  { %1172 = vset.pattern.permute.xlu1 %v1824_v57 }
 0x233   :  { %255 = vperm.xlu1 %1172, %v126_v43  }
 0x237   :  { %1174 = vset.pattern.permute.xlu1 %v1820_v40 }
 0x281   :  { %v139_v58 = vpop.permute.xlu1 %138  ;;  %v130_v61 = vpop.permute.xlu0 %129 }
 0x282   :  { %v136_v19 = vmul.f32 %v1505_v34, %v130_v61 }
 0x286   :  { %v148_v59 = vpop.permute.xlu1 %147  ;;  %v157_v63 = vpop.permute.xlu0 %156 }
 0x287   :  { %v154_v43 = vmul.f32 %v1489_v27, %v148_v59  ;;  %v163_v0 = vmul.f32 %v1492_v29, %v157_v63 }
 0x289   :  { %v273_v18 = vadd.f32 %v163_v0, %v154_v43 }
 0x28b   :  { %v166_v60 = vpop.permute.xlu1 %165  ;;  %v184_v5 = vpop.permute.xlu0 %183 }
 0x28c   :  { %v190_v21 = vmul.f32 %v1499_v6, %v184_v5  ;;  %v172_v59 = vmul.f32 %v1510_v36, %v166_v60 }
 0x290   :  { %v175_v62 = vpop.permute.xlu1 %174  ;;  %v211_v13 = vpop.permute.xlu0 %210 }
 0x291   :  { %v181_v3 = vmul.f32 %v1494_v30, %v175_v62 }
 0x293   :  { %v274_v53 = vadd.f32 %v181_v3, %v172_v59 }
 0x295   :  { %v193_v2 = vpop.permute.xlu1 %192  ;;  %v238_v31 = vpop.permute.xlu0 %237 }
 0x296   :  { %v199_v9 = vmul.f32 %v1483_v24, %v193_v2  ;;  %v145_v2 = vmul.f32 %v1508_v35, %v139_v58  ;;  %v244_v25 = vmul.f32 %v1524_v4, %v238_v31 }
 0x298   :  { %v275_v63 = vadd.f32 %v199_v9, %v190_v21  ;;  %v272_v57 = vadd.f32 %v145_v2, %v136_v19 }
 0x29a   :  { %v202_v11 = vpop.permute.xlu1 %201  ;;  %v265_v40 = vpop.permute.xlu0 %264  ;;  %v281_v9 = vadd.f32 %v275_v63, %v274_v53 }
 0x29b   :  { %v208_v62 = vmul.f32 %v1513_v37, %v202_v11  ;;  %v271_v58 = vmul.f32 %v1527_v8, %v265_v40 }
 0x29f   :  { %v220_v12 = vpop.permute.xlu1 %219 }
 0x2a0   :  { %v226_v22 = vmul.f32 %v1502_v33, %v220_v12  ;;  %v280_v12 = vadd.f32 %v273_v18, %v272_v57 }
 0x2a2   :  { %v284_v0 = vadd.f32 %v281_v9, %v280_v12 }
 0x2a4   :  { %v229_v23 = vpop.permute.xlu1 %228 }
 0x2a5   :  { %v235_v10 = vmul.f32 %v1497_v32, %v229_v23  ;;  %v217_v23 = vmul.f32 %v1516_v41, %v211_v13 }
 0x2a7   :  { %v277_v61 = vadd.f32 %v235_v10, %v226_v22  ;;  %v276_v21 = vadd.f32 %v217_v23, %v208_v62  ;;  %v1862_v23 = vmov 44  }
 0x2a9   :  { %v247_v7 = vpop.permute.xlu1 %246  ;;  %v282_v55 = vadd.f32 %v277_v61, %v276_v21 }
 0x2aa   :  { %v253_v5 = vmul.f32 %v1519_v42, %v247_v7 }
 0x2ac   :  { %v278_v11 = vadd.f32 %v253_v5, %v244_v25  ;;  %v1864_v25 = vmov 47  }
 0x2ae   :  { %v256_v20 = vpop.permute.xlu1 %255 }
 0x2af   :  { %v262_v60 = vmul.f32 %v1530_v1, %v256_v20  ;;  %v1863_v20 = vmov 46  }
 0x2b1   :  { %v279_v51 = vadd.f32 %v271_v58, %v262_v60  ;;  %v1865_v58 = vmov 32  }
 0x2b3   :  { %v283_v7 = vadd.f32 %v279_v51, %v278_v11  ;;  %v299_v51 = vrot.slane %v1454_v38, 6  ;;  %v1861_v38 = vmov 43  }
 0x2b5   :  { %v285_v3 = vadd.f32 %v283_v7, %v282_v55 }
 0x2b7   :  { %v286_v43 = vadd.f32 %v285_v3, %v284_v0 }
 0x2b9   :  { %v288_v13 = vrot.slane %v286_v43, 6 }
 0x2bb   :  { %v290_v59 = vadd.f32 %v288_v13, %v1448_v28 }
 0x2bd   :  { %1283 = vtanh.f32 %v290_v59  ;;  %v1120_v40 = vmul.f32 -1.442695, %v290_v59 }
 0x2bf   :  { %1285 = vpow2.f32 %v1120_v40 }
 0x2ca   :  { %v1284_v31 = vpop.eup %1283 }
 0x2cb   :  { %303 = vrot.lane.b32.xlu1 %v1284_v31, %s1347_s26 }
 0x2cc   :  { %v1286_v10 = vpop.eup %1285 }
 0x2cd   :  { %v294_v53 = vadd.f32 1.0, %v1286_v10 }
 0x2cf   :  { %1287 = vrcp.f32 %v294_v53 }
 0x2dc   :  { %v1288_v2 = vpop.eup %1287 }
 0x2dd   :  { %v301_v55 = vmul.f32 %v1288_v2, %v299_v51 }
 0x33d   :  { %v304_v19 = vpop.permute.xlu1 %303 }
 0x33e   :  { %v306_v57 = vmul.f32 %v1288_v2, %v304_v19 }
 0x340   :  { %308 = vrot.lane.b32.xlu1 %v306_v57, %s1348_s3 }
 0x3b2   :  { %v309_v63 = vpop.permute.xlu1 %308 }
 0x3b3   :  { %v1546_v62 = vadd.f32 %v309_v63, %v301_v55 }
 0x3b5   :  { %1289 = vtanh.f32 %v1546_v62 }
 0x3c2   :  { %v1290_v22 = vpop.eup %1289 }
 0x3c3   :  { %314 = vrot.lane.b32.xlu0 %v1290_v22, %s1348_s3 }
 0x435   :  { %v315_v5 = vpop.permute.xlu0 %314 }
 0x436   :  { %v317_v18 = vmul.f32 %v1288_v2, %v315_v5 }
 0x438   :  { %325 = vperm.xlu0 %1175, %v317_v18   ;;  %320 = vperm.xlu1 %1174, %v317_v18  }
 0x43c   :  { %1178 = vset.pattern.permute.xlu0 %v1850_v46  ;;  %1176 = vset.pattern.permute.xlu1 %v1848_v44 }
 0x43d   :  { %340 = vperm.xlu0 %1178, %v317_v18   ;;  %330 = vperm.xlu1 %1176, %v317_v18  }
 0x441   :  { %1181 = vset.pattern.permute.xlu0 %v1846_v50  ;;  %1177 = vset.pattern.permute.xlu1 %v1844_v45 }
 0x442   :  { %355 = vperm.xlu0 %1181, %v317_v18   ;;  %335 = vperm.xlu1 %1177, %v317_v18  }
 0x446   :  { %1184 = vset.pattern.permute.xlu0 %v1842_v54  ;;  %1179 = vset.pattern.permute.xlu1 %v1840_v48 }
 0x447   :  { %370 = vperm.xlu0 %1184, %v317_v18   ;;  %345 = vperm.xlu1 %1179, %v317_v18  }
 0x44b   :  { %1187 = vset.pattern.permute.xlu0 %v1838_v56  ;;  %1180 = vset.pattern.permute.xlu1 %v1836_v47 }
 0x44c   :  { %385 = vperm.xlu0 %1187, %v317_v18   ;;  %350 = vperm.xlu1 %1180, %v317_v18  }
 0x450   :  { %1182 = vset.pattern.permute.xlu1 %v1834_v52  ;;  %1191 = vset.pattern.permute.xlu0 %v1830_v39 }
 0x451   :  { %360 = vperm.xlu1 %1182, %v317_v18  }
 0x455   :  { %1183 = vset.pattern.permute.xlu1 %v1832_v49 }
 0x456   :  { %365 = vperm.xlu1 %1183, %v317_v18  }
 0x45a   :  { %1185 = vset.pattern.permute.xlu1 %v1861_v38 }
 0x45b   :  { %375 = vperm.xlu1 %1185, %v317_v18  }
 0x45f   :  { %1186 = vset.pattern.permute.xlu1 %v1862_v23 }
 0x460   :  { %380 = vperm.xlu1 %1186, %v317_v18  }
 0x464   :  { %1188 = vset.pattern.permute.xlu1 %v1863_v20 }
 0x465   :  { %390 = vperm.xlu1 %1188, %v317_v18  }
 0x469   :  { %1189 = vset.pattern.permute.xlu1 %v1864_v25 }
 0x46a   :  { %395 = vperm.xlu1 %1189, %v317_v18  }
 0x46e   :  { %1190 = vset.pattern.permute.xlu1 %v1865_v58 }
 0x4b3   :  { %v321_v61 = vpop.permute.xlu1 %320  ;;  %v326_v12 = vpop.permute.xlu0 %325 }
 0x4b4   :  { %v328_v55 = vmul.f32 %v326_v12, %v1508_v35  ;;  %v323_v63 = vmul.f32 %v321_v61, %v1505_v34 }
 0x4b8   :  { %v331_v60 = vpop.permute.xlu1 %330  ;;  %v341_v0 = vpop.permute.xlu0 %340 }
 0x4b9   :  { %v343_v22 = vmul.f32 %v341_v0, %v1510_v36  ;;  %v333_v5 = vmul.f32 %v331_v60, %v1489_v27  ;;  %v399_v60 = vadd.f32 %v328_v55, %v323_v63 }
 0x4bd   :  { %v336_v9 = vpop.permute.xlu1 %335  ;;  %v356_v43 = vpop.permute.xlu0 %355 }
 0x4be   :  { %v338_v53 = vmul.f32 %v336_v9, %v1492_v29  ;;  %v358_v19 = vmul.f32 %v356_v43, %v1483_v24 }
 0x4c0   :  { %v400_v39 = vadd.f32 %v338_v53, %v333_v5 }
 0x4c2   :  { %v346_v21 = vpop.permute.xlu1 %345  ;;  %v371_v31 = vpop.permute.xlu0 %370 }
 0x4c3   :  { %v348_v2 = vmul.f32 %v346_v21, %v1494_v30  ;;  %v373_v18 = vmul.f32 %v371_v31, %v1502_v33 }
 0x4c5   :  { %v401_v43 = vadd.f32 %v348_v2, %v343_v22 }
 0x4c7   :  { %v351_v11 = vpop.permute.xlu1 %350  ;;  %v386_v57 = vpop.permute.xlu0 %385 }
 0x4c8   :  { %v353_v40 = vmul.f32 %v351_v11, %v1499_v6  ;;  %v388_v49 = vmul.f32 %v386_v57, %v1519_v42 }
 0x4ca   :  { %v402_v11 = vadd.f32 %v358_v19, %v353_v40 }
 0x4cc   :  { %v361_v7 = vpop.permute.xlu1 %360  ;;  %v408_v47 = vadd.f32 %v402_v11, %v401_v43  ;;  %v1867_v43 = vmov 38  }
 0x4cd   :  { %v363_v12 = vmul.f32 %v361_v7, %v1513_v37 }
 0x4d1   :  { %v366_v3 = vpop.permute.xlu1 %365 }
 0x4d2   :  { %v368_v9 = vmul.f32 %v366_v3, %v1516_v41  ;;  %v407_v3 = vadd.f32 %v400_v39, %v399_v60 }
 0x4d4   :  { %v403_v31 = vadd.f32 %v368_v9, %v363_v12  ;;  %v411_v53 = vadd.f32 %v408_v47, %v407_v3  ;;  %v426_v47 = vrot.slane %v1546_v62, 6  ;;  %v1866_v62 = vmov 45  }
 0x4d5   :  { %v1869_v12 = vmov 0  }
 0x4d6   :  { %v376_v13 = vpop.permute.xlu1 %375 }
 0x4d7   :  { %v378_v51 = vmul.f32 %v376_v13, %v1497_v32 }
 0x4d9   :  { %v404_v52 = vadd.f32 %v378_v51, %v373_v18 }
 0x4db   :  { %v381_v59 = vpop.permute.xlu1 %380  ;;  %v409_v56 = vadd.f32 %v404_v52, %v403_v31 }
 0x4dc   :  { %v383_v21 = vmul.f32 %v381_v59, %v1524_v4 }
 0x4de   :  { %v405_v40 = vadd.f32 %v388_v49, %v383_v21 }
 0x4e0   :  { %v391_v10 = vpop.permute.xlu1 %390 }
 0x4e1   :  { %v393_v61 = vmul.f32 %v391_v10, %v1530_v1 }
 0x4e5   :  { %v396_v13 = vpop.permute.xlu1 %395 }
 0x4e6   :  { %v398_v0 = vmul.f32 %v396_v13, %v1527_v8  ;;  %v1868_v13 = vmov 40  }
 0x4e8   :  { %v406_v19 = vadd.f32 %v398_v0, %v393_v61  ;;  %v1870_v61 = vmov 41   ;;  %v1871_v0 = vmov 1  }
 0x4ea   :  { %v410_v59 = vadd.f32 %v406_v19, %v405_v40 }
 0x4ec   :  { %v412_v2 = vadd.f32 %v410_v59, %v409_v56 }
 0x4ee   :  { %v413_v22 = vadd.f32 %v412_v2, %v411_v53 }
 0x4f0   :  { %v415_v57 = vrot.slane %v413_v22, 6 }
 0x4f2   :  { %v417_v5 = vadd.f32 %v415_v57, %v1448_v28 }
 0x4f4   :  { %1291 = vtanh.f32 %v417_v5  ;;  %v1121_v10 = vmul.f32 -1.442695, %v417_v5 }
 0x4f6   :  { %1293 = vpow2.f32 %v1121_v10 }
 0x501   :  { %v1292_v7 = vpop.eup %1291 }
 0x502   :  { %430 = vrot.lane.b32.xlu0 %v1292_v7, %s1347_s26 }
 0x503   :  { %v1294_v51 = vpop.eup %1293 }
 0x504   :  { %v421_v55 = vadd.f32 1.0, %v1294_v51 }
 0x506   :  { %1295 = vrcp.f32 %v421_v55 }
 0x513   :  { %v1296_v49 = vpop.eup %1295 }
 0x514   :  { %v428_v52 = vmul.f32 %v1296_v49, %v426_v47 }
 0x574   :  { %v431_v63 = vpop.permute.xlu0 %430 }
 0x575   :  { %v433_v39 = vmul.f32 %v1296_v49, %v431_v63 }
 0x577   :  { %435 = vrot.lane.b32.xlu1 %v433_v39, %s1348_s3 }
 0x5e9   :  { %v436_v56 = vpop.permute.xlu1 %435 }
 0x5ea   :  { %v1586_v18 = vadd.f32 %v436_v56, %v428_v52 }
 0x5ec   :  { %1297 = vtanh.f32 %v1586_v18 }
 0x5f9   :  { %v1298_v11 = vpop.eup %1297 }
 0x5fa   :  { %441 = vrot.lane.b32.xlu0 %v1298_v11, %s1348_s3 }
 0x66c   :  { %v442_v9 = vpop.permute.xlu0 %441 }
 0x66d   :  { %v444_v21 = vmul.f32 %v1296_v49, %v442_v9 }
 0x66f   :  { %452 = vperm.xlu0 %1191, %v444_v21   ;;  %447 = vperm.xlu1 %1190, %v444_v21  }
 0x673   :  { %1194 = vset.pattern.permute.xlu0 %v1850_v46  ;;  %1192 = vset.pattern.permute.xlu1 %v1848_v44 }
 0x674   :  { %467 = vperm.xlu0 %1194, %v444_v21   ;;  %457 = vperm.xlu1 %1192, %v444_v21  }
 0x678   :  { %1197 = vset.pattern.permute.xlu0 %v1846_v50  ;;  %1193 = vset.pattern.permute.xlu1 %v1844_v45 }
 0x679   :  { %482 = vperm.xlu0 %1197, %v444_v21   ;;  %462 = vperm.xlu1 %1193, %v444_v21  }
 0x67d   :  { %1200 = vset.pattern.permute.xlu0 %v1842_v54  ;;  %1195 = vset.pattern.permute.xlu1 %v1840_v48 }
 0x67e   :  { %497 = vperm.xlu0 %1200, %v444_v21   ;;  %472 = vperm.xlu1 %1195, %v444_v21  }
 0x682   :  { %1203 = vset.pattern.permute.xlu0 %v1866_v62  ;;  %1196 = vset.pattern.permute.xlu1 %v1867_v43 }
 0x683   :  { %512 = vperm.xlu0 %1203, %v444_v21   ;;  %477 = vperm.xlu1 %1196, %v444_v21  }
 0x687   :  { %1198 = vset.pattern.permute.xlu1 %v1868_v13  ;;  %1206 = vset.pattern.permute.xlu0 %v1869_v12 }
 0x688   :  { %487 = vperm.xlu1 %1198, %v444_v21  }
 0x68c   :  { %1199 = vset.pattern.permute.xlu1 %v1870_v61 }
 0x68d   :  { %492 = vperm.xlu1 %1199, %v444_v21  }
 0x691   :  { %1201 = vset.pattern.permute.xlu1 %v1861_v38 }
 0x692   :  { %502 = vperm.xlu1 %1201, %v444_v21  }
 0x696   :  { %1202 = vset.pattern.permute.xlu1 %v1862_v23 }
 0x697   :  { %507 = vperm.xlu1 %1202, %v444_v21  }
 0x69b   :  { %1204 = vset.pattern.permute.xlu1 %v1863_v20 }
 0x69c   :  { %517 = vperm.xlu1 %1204, %v444_v21  }
 0x6a0   :  { %1205 = vset.pattern.permute.xlu1 %v1864_v25 }
 0x6a1   :  { %522 = vperm.xlu1 %1205, %v444_v21  }
 0x6a5   :  { %1207 = vset.pattern.permute.xlu1 %v1871_v0 }
 0x6ea   :  { %v448_v60 = vpop.permute.xlu1 %447  ;;  %v453_v59 = vpop.permute.xlu0 %452 }
 0x6eb   :  { %v455_v56 = vmul.f32 %v453_v59, %v1508_v35  ;;  %v450_v11 = vmul.f32 %v448_v60, %v1505_v34 }
 0x6ef   :  { %v458_v31 = vpop.permute.xlu1 %457  ;;  %v468_v2 = vpop.permute.xlu0 %467 }
 0x6f0   :  { %v470_v9 = vmul.f32 %v468_v2, %v1510_v36  ;;  %v460_v21 = vmul.f32 %v458_v31, %v1489_v27  ;;  %v526_v31 = vadd.f32 %v455_v56, %v450_v11 }
 0x6f4   :  { %v463_v40 = vpop.permute.xlu1 %462  ;;  %v483_v57 = vpop.permute.xlu0 %482 }
 0x6f5   :  { %v465_v49 = vmul.f32 %v463_v40, %v1492_v29  ;;  %v485_v39 = vmul.f32 %v483_v57, %v1483_v24 }
 0x6f9   :  { %v473_v19 = vpop.permute.xlu1 %472  ;;  %v498_v10 = vpop.permute.xlu0 %497 }
 0x6fa   :  { %v475_v63 = vmul.f32 %v473_v19, %v1494_v30  ;;  %v500_v12 = vmul.f32 %v498_v10, %v1502_v33 }
 0x6fc   :  { %v528_v57 = vadd.f32 %v475_v63, %v470_v9 }
 0x6fe   :  { %v478_v3 = vpop.permute.xlu1 %477  ;;  %v513_v47 = vpop.permute.xlu0 %512 }
 0x6ff   :  { %v480_v51 = vmul.f32 %v478_v3, %v1499_v6  ;;  %v527_v3 = vadd.f32 %v465_v49, %v460_v21  ;;  %v515_v48 = vmul.f32 %v513_v47, %v1519_v42 }
 0x701   :  { %v529_v0 = vadd.f32 %v485_v39, %v480_v51 }
 0x703   :  { %v488_v53 = vpop.permute.xlu1 %487  ;;  %v535_v45 = vadd.f32 %v529_v0, %v528_v57 }
 0x704   :  { %v490_v59 = vmul.f32 %v488_v53, %v1513_v37 }
 0x708   :  { %v493_v22 = vpop.permute.xlu1 %492 }
 0x709   :  { %v495_v40 = vmul.f32 %v493_v22, %v1516_v41  ;;  %v534_v22 = vadd.f32 %v527_v3, %v526_v31  ;;  %v1878_v31 = vmov 2  }
 0x70b   :  { %v530_v10 = vadd.f32 %v495_v40, %v490_v59  ;;  %v538_v49 = vadd.f32 %v535_v45, %v534_v22  ;;  %v26_v45 = vld [vmem:[%s1809_s0 + $0x8] sm:$0xff]  ;;  %v1875_v59 = vmov 42  }
 0x70d   :  { %v503_v5 = vpop.permute.xlu1 %502 }
 0x70e   :  { %v505_v52 = vmul.f32 %v503_v5, %v1497_v32 }
 0x710   :  { %v531_v54 = vadd.f32 %v505_v52, %v500_v12 }
 0x712   :  { %v508_v7 = vpop.permute.xlu1 %507  ;;  %v536_v50 = vadd.f32 %v531_v54, %v530_v10 }
 0x713   :  { %v510_v19 = vmul.f32 %v508_v7, %v1524_v4 }
 0x715   :  { %v532_v51 = vadd.f32 %v515_v48, %v510_v19  ;;  %v1872_v19 = vmov 33  }
 0x717   :  { %v518_v55 = vpop.permute.xlu1 %517 }
 0x718   :  { %v520_v60 = vmul.f32 %v518_v55, %v1530_v1 }
 0x71c   :  { %v523_v5 = vpop.permute.xlu1 %522 }
 0x71d   :  { %v525_v2 = vmul.f32 %v523_v5, %v1527_v8  ;;  %v1874_v5 = vmov 35  }
 0x71f   :  { %v533_v39 = vadd.f32 %v525_v2, %v520_v60  ;;  %v1876_v60 = vmov 37   ;;  %v1877_v2 = vmov 3  }
 0x721   :  { %v537_v7 = vadd.f32 %v533_v39, %v532_v51 }
 0x723   :  { %v539_v63 = vadd.f32 %v537_v7, %v536_v50 }
 0x725   :  { %v540_v9 = vadd.f32 %v539_v63, %v538_v49 }
 0x727   :  { %v542_v47 = vrot.slane %v540_v9, 6 }
 0x729   :  { %v544_v21 = vadd.f32 %v542_v47, %v1448_v28  ;;  %v553_v28 = vrot.slane %v1586_v18, 6  ;;  %v1873_v18 = vmov 39  }
 0x72b   :  { %1299 = vtanh.f32 %v544_v21  ;;  %v1122_v55 = vmul.f32 -1.442695, %v544_v21 }
 0x72d   :  { %1301 = vpow2.f32 %v1122_v55 }
 0x738   :  { %v1300_v53 = vpop.eup %1299 }
 0x739   :  { %557 = vrot.lane.b32.xlu0 %v1300_v53, %s1347_s26 }
 0x73a   :  { %v1302_v52 = vpop.eup %1301 }
 0x73b   :  { %v548_v56 = vadd.f32 1.0, %v1302_v52 }
 0x73d   :  { %1303 = vrcp.f32 %v548_v56 }
 0x74a   :  { %v1304_v48 = vpop.eup %1303 }
 0x74b   :  { %v555_v50 = vmul.f32 %v1304_v48, %v553_v28 }
 0x7ab   :  { %v558_v11 = vpop.permute.xlu0 %557 }
 0x7ac   :  { %v560_v12 = vmul.f32 %v1304_v48, %v558_v11 }
 0x7ae   :  { %562 = vrot.lane.b32.xlu1 %v560_v12, %s1348_s3 }
 0x7b2   :  { %52 = vperm.xlu1 %1207, %v26_v45  }
 0x7b6   :  { %1208 = vset.pattern.permute.xlu1 %v1865_v58 }
 0x820   :  { %v563_v54 = vpop.permute.xlu1 %562 }
 0x821   :  { %v1630_v0 = vadd.f32 %v563_v54, %v555_v50 }
 0x823   :  { %1305 = vtanh.f32 %v1630_v0 }
 0x82d   :  { %v53_v10 = vpop.permute.xlu1 %52 }
 0x830   :  { %v1306_v40 = vpop.eup %1305 }
 0x831   :  { %568 = vrot.lane.b32.xlu0 %v1306_v40, %s1348_s3 }
 0x835   :  { %38 = vperm.xlu0 %1206, %v26_v45  }
 0x839   :  { %1209 = vset.pattern.permute.xlu0 %v1872_v19 }
 0x8a3   :  { %v569_v3 = vpop.permute.xlu0 %568 }
 0x8a4   :  { %v571_v57 = vmul.f32 %v1304_v48, %v569_v3 }
 0x8a6   :  { %579 = vperm.xlu0 %1209, %v571_v57   ;;  %574 = vperm.xlu1 %1208, %v571_v57  }
 0x8aa   :  { %1212 = vset.pattern.permute.xlu0 %v1850_v46  ;;  %1210 = vset.pattern.permute.xlu1 %v1848_v44 }
 0x8ab   :  { %594 = vperm.xlu0 %1212, %v571_v57   ;;  %584 = vperm.xlu1 %1210, %v571_v57  }
 0x8af   :  { %1215 = vset.pattern.permute.xlu0 %v1873_v18  ;;  %1211 = vset.pattern.permute.xlu1 %v1874_v5 }
 0x8b0   :  { %609 = vperm.xlu0 %1215, %v571_v57   ;;  %589 = vperm.xlu1 %1211, %v571_v57   ;;  %v39_v49 = vpop.permute.xlu0 %38 }
 0x8b4   :  { %1218 = vset.pattern.permute.xlu0 %v1875_v59  ;;  %1213 = vset.pattern.permute.xlu1 %v1876_v60 }
 0x8b5   :  { %624 = vperm.xlu0 %1218, %v571_v57   ;;  %599 = vperm.xlu1 %1213, %v571_v57  }
 0x8b9   :  { %1221 = vset.pattern.permute.xlu0 %v1866_v62  ;;  %1214 = vset.pattern.permute.xlu1 %v1867_v43 }
 0x8ba   :  { %639 = vperm.xlu0 %1221, %v571_v57   ;;  %604 = vperm.xlu1 %1214, %v571_v57  }
 0x8be   :  { %1216 = vset.pattern.permute.xlu1 %v1868_v13  ;;  %1225 = vset.pattern.permute.xlu0 %v1877_v2 }
 0x8bf   :  { %614 = vperm.xlu1 %1216, %v571_v57   ;;  %80 = vperm.xlu0 %1225, %v26_v45  }
 0x8c3   :  { %1217 = vset.pattern.permute.xlu1 %v1870_v61  ;;  %1227 = vset.pattern.permute.xlu0 %v1872_v19 }
 0x8c4   :  { %619 = vperm.xlu1 %1217, %v571_v57  }
 0x8c8   :  { %1219 = vset.pattern.permute.xlu1 %v1861_v38 }
 0x8c9   :  { %629 = vperm.xlu1 %1219, %v571_v57  }
 0x8cd   :  { %1220 = vset.pattern.permute.xlu1 %v1862_v23 }
 0x8ce   :  { %634 = vperm.xlu1 %1220, %v571_v57  }
 0x8d2   :  { %1222 = vset.pattern.permute.xlu1 %v1863_v20 }
 0x8d3   :  { %644 = vperm.xlu1 %1222, %v571_v57  }
 0x8d7   :  { %1223 = vset.pattern.permute.xlu1 %v1864_v25 }
 0x8d8   :  { %649 = vperm.xlu1 %1223, %v571_v57  }
 0x8dc   :  { %1224 = vset.pattern.permute.xlu1 %v1878_v31 }
 0x8dd   :  { %66 = vperm.xlu1 %1224, %v26_v45  }
 0x8e1   :  { %1226 = vset.pattern.permute.xlu1 %v1865_v58 }
 0x921   :  { %v575_v51 = vpop.permute.xlu1 %574  ;;  %v580_v9 = vpop.permute.xlu0 %579 }
 0x922   :  { %v577_v3 = vmul.f32 %v575_v51, %v1505_v34  ;;  %v582_v57 = vmul.f32 %v580_v9, %v1508_v35 }
 0x926   :  { %v585_v39 = vpop.permute.xlu1 %584  ;;  %v595_v21 = vpop.permute.xlu0 %594 }
 0x927   :  { %v587_v2 = vmul.f32 %v585_v39, %v1489_v27  ;;  %v597_v31 = vmul.f32 %v595_v21, %v1510_v36  ;;  %v653_v27 = vadd.f32 %v582_v57, %v577_v3 }
 0x92b   :  { %v590_v22 = vpop.permute.xlu1 %589  ;;  %v610_v55 = vpop.permute.xlu0 %609 }
 0x92c   :  { %v592_v45 = vmul.f32 %v590_v22, %v1492_v29  ;;  %v612_v50 = vmul.f32 %v610_v55, %v1483_v24 }
 0x92e   :  { %v654_v46 = vadd.f32 %v592_v45, %v587_v2  ;;  %v46_v45 = vmul.f32 %v1430_v15, %v39_v49  ;;  %v680_v49 = vrot.slane %v1630_v0, 6 }
 0x930   :  { %v600_v7 = vpop.permute.xlu1 %599  ;;  %v625_v48 = vpop.permute.xlu0 %624 }
 0x931   :  { %v602_v28 = vmul.f32 %v600_v7, %v1494_v30 }
 0x933   :  { %v655_v55 = vadd.f32 %v602_v28, %v597_v31 }
 0x935   :  { %v605_v63 = vpop.permute.xlu1 %604  ;;  %v640_v54 = vpop.permute.xlu0 %639 }
 0x936   :  { %v607_v11 = vmul.f32 %v605_v63, %v1499_v6  ;;  %v627_v63 = vmul.f32 %v625_v48, %v1502_v33  ;;  %v642_v24 = vmul.f32 %v640_v54, %v1519_v42  ;;  %v661_v54 = vadd.f32 %v654_v46, %v653_v27 }
 0x938   :  { %v656_v44 = vadd.f32 %v612_v50, %v607_v11 }
 0x93a   :  { %v615_v47 = vpop.permute.xlu1 %614  ;;  %v81_v21 = vpop.permute.xlu0 %80  ;;  %v662_v48 = vadd.f32 %v656_v44, %v655_v55 }
 0x93b   :  { %v617_v51 = vmul.f32 %v615_v47, %v1513_v37  ;;  %v88_v28 = vmul.f32 %v1433_v16, %v81_v21  ;;  %v1879_v21 = vmov 36  }
 0x93c   :  { %v665_v31 = vadd.f32 %v662_v48, %v661_v54  ;;  %v1880_v48 = vmov 34  }
 0x93f   :  { %v620_v53 = vpop.permute.xlu1 %619 }
 0x940   :  { %v622_v22 = vmul.f32 %v620_v53, %v1516_v41 }
 0x942   :  { %v657_v11 = vadd.f32 %v622_v22, %v617_v51 }
 0x944   :  { %v630_v52 = vpop.permute.xlu1 %629 }
 0x945   :  { %v632_v40 = vmul.f32 %v630_v52, %v1497_v32 }
 0x947   :  { %v658_v34 = vadd.f32 %v632_v40, %v627_v63 }
 0x949   :  { %v635_v56 = vpop.permute.xlu1 %634  ;;  %v663_v2 = vadd.f32 %v658_v34, %v657_v11 }
 0x94a   :  { %v637_v7 = vmul.f32 %v635_v56, %v1524_v4  ;;  %v60_v56 = vmul.f32 %v1436_v17, %v53_v10 }
 0x94c   :  { %v659_v50 = vadd.f32 %v642_v24, %v637_v7 }
 0x94e   :  { %v645_v12 = vpop.permute.xlu1 %644 }
 0x94f   :  { %v647_v9 = vmul.f32 %v645_v12, %v1530_v1 }
 0x953   :  { %v650_v52 = vpop.permute.xlu1 %649 }
 0x954   :  { %v652_v39 = vmul.f32 %v650_v52, %v1527_v8  ;;  %v90_v52 = vadd.f32 %v60_v56, %v46_v45 }
 0x956   :  { %v660_v53 = vadd.f32 %v652_v39, %v647_v9 }
 0x958   :  { %v664_v47 = vadd.f32 %v660_v53, %v659_v50  ;;  %v67_v40 = vpop.permute.xlu1 %66 }
 0x959   :  { %v74_v12 = vmul.f32 %v1427_v14, %v67_v40 }
 0x95a   :  { %v666_v63 = vadd.f32 %v664_v47, %v663_v2 }
 0x95b   :  { %v92_v3 = vadd.f32 %v88_v28, %v74_v12 }
 0x95c   :  { %v667_v44 = vadd.f32 %v666_v63, %v665_v31 }
 0x95d   :  { %v94_v57 = vadd.f32 %v92_v3, %v90_v52 }
 0x95e   :  { %v669_v24 = vrot.slane %v667_v44, 6 }
 0x95f   :  { %v1674_v22 = vadd.f32 %v1445_v26, %v94_v57  ;;  %v1881_v57 = vld [vmem:[#allocation3_spill] sm:$0xff] }
 0x961   :  { %v671_v15 = vadd.f32 %v669_v24, %v1674_v22 }
 0x963   :  { %1307 = vtanh.f32 %v671_v15  ;;  %v1123_v17 = vmul.f32 -1.442695, %v671_v15 }
 0x965   :  { %1309 = vpow2.f32 %v1123_v17 }
 0x970   :  { %v1308_v16 = vpop.eup %1307 }
 0x971   :  { %684 = vrot.lane.b32.xlu1 %v1308_v16, %s1347_s26 }
 0x972   :  { %v1310_v46 = vpop.eup %1309 }
 0x973   :  { %v675_v14 = vadd.f32 1.0, %v1310_v46  ;;  %v1882_v46 = vld [vmem:[#allocation5_spill] sm:$0xff] }
 0x975   :  { %1311 = vrcp.f32 %v675_v14 }
 0x982   :  { %v1312_v27 = vpop.eup %1311 }
 0x983   :  { %v682_v26 = vmul.f32 %v1312_v27, %v680_v49 }
 0x9e3   :  { %v685_v34 = vpop.permute.xlu1 %684 }
 0x9e4   :  { %v687_v10 = vmul.f32 %v1312_v27, %v685_v34  ;;  %v1883_v34 = vld [vmem:[#allocation4_spill] sm:$0xff] }
 0x9e6   :  { %689 = vrot.lane.b32.xlu1 %v687_v10, %s1348_s3 }
 0xa58   :  { %v690_v7 = vpop.permute.xlu1 %689 }
 0xa59   :  { %v1680_v55 = vadd.f32 %v690_v7, %v682_v26 }
 0xa5b   :  { %1313 = vtanh.f32 %v1680_v55 }
 0xa68   :  { %v1314_v51 = vpop.eup %1313 }
 0xa69   :  { %695 = vrot.lane.b32.xlu0 %v1314_v51, %s1348_s3 }
 0xadb   :  { %v696_v9 = vpop.permute.xlu0 %695 }
 0xadc   :  { %v698_v39 = vmul.f32 %v1312_v27, %v696_v9 }
 0xade   :  { %706 = vperm.xlu0 %1227, %v698_v39   ;;  %701 = vperm.xlu1 %1226, %v698_v39  }
 0xae2   :  { %1230 = vset.pattern.permute.xlu0 %v1879_v21  ;;  %1228 = vset.pattern.permute.xlu1 %v1880_v48 }
 0xae3   :  { %721 = vperm.xlu0 %1230, %v698_v39   ;;  %711 = vperm.xlu1 %1228, %v698_v39  }
 0xae7   :  { %1233 = vset.pattern.permute.xlu0 %v1873_v18  ;;  %1229 = vset.pattern.permute.xlu1 %v1874_v5 }
 0xae8   :  { %736 = vperm.xlu0 %1233, %v698_v39   ;;  %716 = vperm.xlu1 %1229, %v698_v39  }
 0xaec   :  { %1236 = vset.pattern.permute.xlu0 %v1875_v59  ;;  %1231 = vset.pattern.permute.xlu1 %v1876_v60 }
 0xaed   :  { %751 = vperm.xlu0 %1236, %v698_v39   ;;  %726 = vperm.xlu1 %1231, %v698_v39  }
 0xaf1   :  { %1239 = vset.pattern.permute.xlu0 %v1866_v62  ;;  %1232 = vset.pattern.permute.xlu1 %v1867_v43 }
 0xaf2   :  { %766 = vperm.xlu0 %1239, %v698_v39   ;;  %731 = vperm.xlu1 %1232, %v698_v39  }
 0xaf6   :  { %1234 = vset.pattern.permute.xlu1 %v1868_v13  ;;  %1243 = vset.pattern.permute.xlu0 %v1872_v19 }
 0xaf7   :  { %741 = vperm.xlu1 %1234, %v698_v39  }
 0xafb   :  { %1235 = vset.pattern.permute.xlu1 %v1870_v61 }
 0xafc   :  { %746 = vperm.xlu1 %1235, %v698_v39  }
 0xb00   :  { %1237 = vset.pattern.permute.xlu1 %v1861_v38 }
 0xb01   :  { %756 = vperm.xlu1 %1237, %v698_v39  }
 0xb05   :  { %1238 = vset.pattern.permute.xlu1 %v1862_v23 }
 0xb06   :  { %761 = vperm.xlu1 %1238, %v698_v39  }
 0xb0a   :  { %1240 = vset.pattern.permute.xlu1 %v1863_v20 }
 0xb0b   :  { %771 = vperm.xlu1 %1240, %v698_v39  }
 0xb0f   :  { %1241 = vset.pattern.permute.xlu1 %v1864_v25 }
 0xb10   :  { %776 = vperm.xlu1 %1241, %v698_v39  }
 0xb14   :  { %1242 = vset.pattern.permute.xlu1 %v1865_v58 }
 0xb59   :  { %v702_v0 = vpop.permute.xlu1 %701  ;;  %v707_v45 = vpop.permute.xlu0 %706 }
 0xb5a   :  { %v709_v17 = vmul.f32 %v707_v45, %v1508_v35  ;;  %v704_v14 = vmul.f32 %v702_v0, %v1882_v46 }
 0xb5e   :  { %v712_v11 = vpop.permute.xlu1 %711  ;;  %v722_v54 = vpop.permute.xlu0 %721 }
 0xb5f   :  { %v724_v27 = vmul.f32 %v722_v54, %v1510_v36  ;;  %v714_v10 = vmul.f32 %v712_v11, %v1883_v34  ;;  %v780_v11 = vadd.f32 %v709_v17, %v704_v14 }
 0xb63   :  { %v717_v50 = vpop.permute.xlu1 %716  ;;  %v737_v47 = vpop.permute.xlu0 %736 }
 0xb64   :  { %v719_v3 = vmul.f32 %v717_v50, %v1492_v29  ;;  %v739_v24 = vmul.f32 %v737_v47, %v1881_v57 }
 0xb66   :  { %v781_v9 = vadd.f32 %v719_v3, %v714_v10 }
 0xb68   :  { %v727_v53 = vpop.permute.xlu1 %726  ;;  %v752_v31 = vpop.permute.xlu0 %751 }
 0xb69   :  { %v729_v44 = vmul.f32 %v727_v53, %v1494_v30  ;;  %v754_v49 = vmul.f32 %v752_v31, %v1502_v33 }
 0xb6b   :  { %v782_v39 = vadd.f32 %v729_v44, %v724_v27 }
 0xb6d   :  { %v732_v56 = vpop.permute.xlu1 %731  ;;  %v767_v15 = vpop.permute.xlu0 %766 }
 0xb6e   :  { %v734_v63 = vmul.f32 %v732_v56, %v1499_v6  ;;  %v769_v50 = vmul.f32 %v767_v15, %v1519_v42 }
 0xb70   :  { %v783_v26 = vadd.f32 %v739_v24, %v734_v63 }
 0xb72   :  { %v742_v28 = vpop.permute.xlu1 %741  ;;  %v789_v47 = vadd.f32 %v783_v26, %v782_v39 }
 0xb73   :  { %v744_v56 = vmul.f32 %v742_v28, %v1513_v37 }
 0xb77   :  { %v747_v2 = vpop.permute.xlu1 %746 }
 0xb78   :  { %v749_v7 = vmul.f32 %v747_v2, %v1516_v41  ;;  %v788_v2 = vadd.f32 %v781_v9, %v780_v11 }
 0xb7a   :  { %v792_v3 = vadd.f32 %v789_v47, %v788_v2 }
 0xb7c   :  { %v757_v40 = vpop.permute.xlu1 %756 }
 0xb7d   :  { %v759_v16 = vmul.f32 %v757_v40, %v1497_v32  ;;  %v784_v40 = vadd.f32 %v749_v7, %v744_v56  ;;  %v807_v7 = vrot.slane %v1680_v55, 6 }
 0xb7f   :  { %v785_v45 = vadd.f32 %v759_v16, %v754_v49 }
 0xb81   :  { %v762_v12 = vpop.permute.xlu1 %761  ;;  %v790_v24 = vadd.f32 %v785_v45, %v784_v40 }
 0xb82   :  { %v764_v51 = vmul.f32 %v762_v12, %v1524_v4 }
 0xb84   :  { %v786_v31 = vadd.f32 %v769_v50, %v764_v51 }
 0xb86   :  { %v772_v52 = vpop.permute.xlu1 %771 }
 0xb87   :  { %v774_v0 = vmul.f32 %v772_v52, %v1530_v1 }
 0xb8b   :  { %v777_v53 = vpop.permute.xlu1 %776 }
 0xb8c   :  { %v779_v54 = vmul.f32 %v777_v53, %v1527_v8 }
 0xb8e   :  { %v787_v63 = vadd.f32 %v779_v54, %v774_v0 }
 0xb90   :  { %v791_v12 = vadd.f32 %v787_v63, %v786_v31 }
 0xb92   :  { %v793_v44 = vadd.f32 %v791_v12, %v790_v24 }
 0xb94   :  { %v794_v27 = vadd.f32 %v793_v44, %v792_v3 }
 0xb96   :  { %v796_v15 = vrot.slane %v794_v27, 6 }
 0xb98   :  { %v798_v10 = vadd.f32 %v796_v15, %v1674_v22 }
 0xb9a   :  { %1315 = vtanh.f32 %v798_v10  ;;  %v1124_v52 = vmul.f32 -1.442695, %v798_v10 }
 0xb9c   :  { %1317 = vpow2.f32 %v1124_v52 }
 0xba7   :  { %v1316_v28 = vpop.eup %1315 }
 0xba8   :  { %811 = vrot.lane.b32.xlu0 %v1316_v28, %s1347_s26 }
 0xba9   :  { %v1318_v16 = vpop.eup %1317 }
 0xbaa   :  { %v802_v17 = vadd.f32 1.0, %v1318_v16 }
 0xbac   :  { %1319 = vrcp.f32 %v802_v17 }
 0xbb9   :  { %v1320_v14 = vpop.eup %1319 }
 0xbba   :  { %v809_v51 = vmul.f32 %v1320_v14, %v807_v7 }
 0xc1a   :  { %v812_v49 = vpop.permute.xlu0 %811 }
 0xc1b   :  { %v814_v26 = vmul.f32 %v1320_v14, %v812_v49 }
 0xc1d   :  { %816 = vrot.lane.b32.xlu1 %v814_v26, %s1348_s3 }
 0xc8f   :  { %v817_v9 = vpop.permute.xlu1 %816 }
 0xc90   :  { %v1720_v39 = vadd.f32 %v817_v9, %v809_v51 }
 0xc92   :  { %1321 = vtanh.f32 %v1720_v39 }
 0xc9f   :  { %v1322_v50 = vpop.eup %1321 }
 0xca0   :  { %822 = vrot.lane.b32.xlu0 %v1322_v50, %s1348_s3 }
 0xd12   :  { %v823_v53 = vpop.permute.xlu0 %822 }
 0xd13   :  { %v825_v56 = vmul.f32 %v1320_v14, %v823_v53 }
 0xd15   :  { %833 = vperm.xlu0 %1243, %v825_v56   ;;  %828 = vperm.xlu1 %1242, %v825_v56  }
 0xd19   :  { %1246 = vset.pattern.permute.xlu0 %v1879_v21  ;;  %1244 = vset.pattern.permute.xlu1 %v1880_v48 }
 0xd1a   :  { %848 = vperm.xlu0 %1246, %v825_v56   ;;  %838 = vperm.xlu1 %1244, %v825_v56  }
 0xd1e   :  { %1249 = vset.pattern.permute.xlu0 %v1873_v18  ;;  %1245 = vset.pattern.permute.xlu1 %v1874_v5 }
 0xd1f   :  { %863 = vperm.xlu0 %1249, %v825_v56   ;;  %843 = vperm.xlu1 %1245, %v825_v56  }
 0xd23   :  { %1252 = vset.pattern.permute.xlu0 %v1875_v59  ;;  %1247 = vset.pattern.permute.xlu1 %v1876_v60 }
 0xd24   :  { %878 = vperm.xlu0 %1252, %v825_v56   ;;  %853 = vperm.xlu1 %1247, %v825_v56  }
 0xd28   :  { %1255 = vset.pattern.permute.xlu0 %v1866_v62  ;;  %1248 = vset.pattern.permute.xlu1 %v1867_v43 }
 0xd29   :  { %893 = vperm.xlu0 %1255, %v825_v56   ;;  %858 = vperm.xlu1 %1248, %v825_v56  }
 0xd2d   :  { %1250 = vset.pattern.permute.xlu1 %v1868_v13  ;;  %1259 = vset.pattern.permute.xlu0 %v1872_v19 }
 0xd2e   :  { %868 = vperm.xlu1 %1250, %v825_v56  }
 0xd32   :  { %1251 = vset.pattern.permute.xlu1 %v1870_v61 }
 0xd33   :  { %873 = vperm.xlu1 %1251, %v825_v56  }
 0xd37   :  { %1253 = vset.pattern.permute.xlu1 %v1861_v38 }
 0xd38   :  { %883 = vperm.xlu1 %1253, %v825_v56  }
 0xd3c   :  { %1254 = vset.pattern.permute.xlu1 %v1862_v23 }
 0xd3d   :  { %888 = vperm.xlu1 %1254, %v825_v56  }
 0xd41   :  { %1256 = vset.pattern.permute.xlu1 %v1863_v20 }
 0xd42   :  { %898 = vperm.xlu1 %1256, %v825_v56  }
 0xd46   :  { %1257 = vset.pattern.permute.xlu1 %v1864_v25 }
 0xd47   :  { %903 = vperm.xlu1 %1257, %v825_v56  }
 0xd4b   :  { %1258 = vset.pattern.permute.xlu1 %v1865_v58 }
 0xd90   :  { %v829_v55 = vpop.permute.xlu1 %828  ;;  %v834_v11 = vpop.permute.xlu0 %833 }
 0xd91   :  { %v836_v52 = vmul.f32 %v834_v11, %v1508_v35  ;;  %v831_v16 = vmul.f32 %v829_v55, %v1882_v46 }
 0xd95   :  { %v839_v19 = vpop.permute.xlu1 %838  ;;  %v849_v40 = vpop.permute.xlu0 %848 }
 0xd96   :  { %v851_v17 = vmul.f32 %v849_v40, %v1510_v36  ;;  %v841_v14 = vmul.f32 %v839_v19, %v1883_v34  ;;  %v907_v19 = vadd.f32 %v836_v52, %v831_v16 }
 0xd9a   :  { %v844_v45 = vpop.permute.xlu1 %843  ;;  %v864_v63 = vpop.permute.xlu0 %863 }
 0xd9b   :  { %v846_v27 = vmul.f32 %v844_v45, %v1492_v29  ;;  %v866_v15 = vmul.f32 %v864_v63, %v1881_v57 }
 0xd9d   :  { %v908_v9 = vadd.f32 %v846_v27, %v841_v14 }
 0xd9f   :  { %v854_v0 = vpop.permute.xlu1 %853  ;;  %v879_v12 = vpop.permute.xlu0 %878 }
 0xda0   :  { %v856_v58 = vmul.f32 %v854_v0, %v1494_v30  ;;  %v881_v49 = vmul.f32 %v879_v12, %v1502_v33 }
 0xda2   :  { %v909_v50 = vadd.f32 %v856_v58, %v851_v17 }
 0xda4   :  { %v859_v54 = vpop.permute.xlu1 %858  ;;  %v894_v10 = vpop.permute.xlu0 %893 }
 0xda5   :  { %v861_v3 = vmul.f32 %v859_v54, %v1499_v6  ;;  %v896_v53 = vmul.f32 %v894_v10, %v1519_v42 }
 0xda7   :  { %v910_v26 = vadd.f32 %v866_v15, %v861_v3 }
 0xda9   :  { %v869_v47 = vpop.permute.xlu1 %868  ;;  %v916_v11 = vadd.f32 %v910_v26, %v909_v50 }
 0xdaa   :  { %v871_v45 = vmul.f32 %v869_v47, %v1513_v37 }
 0xdae   :  { %v874_v31 = vpop.permute.xlu1 %873 }
 0xdaf   :  { %v876_v7 = vmul.f32 %v874_v31, %v1516_v41  ;;  %v915_v31 = vadd.f32 %v908_v9, %v907_v19 }
 0xdb1   :  { %v911_v40 = vadd.f32 %v876_v7, %v871_v45  ;;  %v919_v3 = vadd.f32 %v916_v11, %v915_v31 }
 0xdb3   :  { %v884_v2 = vpop.permute.xlu1 %883 }
 0xdb4   :  { %v886_v28 = vmul.f32 %v884_v2, %v1497_v32 }
 0xdb6   :  { %v912_v0 = vadd.f32 %v886_v28, %v881_v49  ;;  %v934_v49 = vrot.slane %v1720_v39, 6 }
 0xdb8   :  { %v889_v24 = vpop.permute.xlu1 %888  ;;  %v917_v12 = vadd.f32 %v912_v0, %v911_v40 }
 0xdb9   :  { %v891_v51 = vmul.f32 %v889_v24, %v1524_v4 }
 0xdbb   :  { %v913_v63 = vadd.f32 %v896_v53, %v891_v51 }
 0xdbd   :  { %v899_v44 = vpop.permute.xlu1 %898 }
 0xdbe   :  { %v901_v55 = vmul.f32 %v899_v44, %v1530_v1 }
 0xdc2   :  { %v904_v56 = vpop.permute.xlu1 %903 }
 0xdc3   :  { %v906_v54 = vmul.f32 %v904_v56, %v1527_v8 }
 0xdc5   :  { %v914_v2 = vadd.f32 %v906_v54, %v901_v55 }
 0xdc7   :  { %v918_v24 = vadd.f32 %v914_v2, %v913_v63 }
 0xdc9   :  { %v920_v27 = vadd.f32 %v918_v24, %v917_v12 }
 0xdcb   :  { %v921_v58 = vadd.f32 %v920_v27, %v919_v3 }
 0xdcd   :  { %v923_v15 = vrot.slane %v921_v58, 6 }
 0xdcf   :  { %v925_v10 = vadd.f32 %v923_v15, %v1674_v22 }
 0xdd1   :  { %1323 = vtanh.f32 %v925_v10  ;;  %v1125_v44 = vmul.f32 -1.442695, %v925_v10 }
 0xdd3   :  { %1325 = vpow2.f32 %v1125_v44 }
 0xdde   :  { %v1324_v47 = vpop.eup %1323 }
 0xddf   :  { %938 = vrot.lane.b32.xlu0 %v1324_v47, %s1347_s26 }
 0xde0   :  { %v1326_v28 = vpop.eup %1325 }
 0xde1   :  { %v929_v52 = vadd.f32 1.0, %v1326_v28 }
 0xde3   :  { %1327 = vrcp.f32 %v929_v52 }
 0xdf0   :  { %v1328_v16 = vpop.eup %1327 }
 0xdf1   :  { %v936_v26 = vmul.f32 %v1328_v16, %v934_v49  ;;  %v1127_v49 = vld [vmem:[%s1813_s4] ss:$0 sm:$0xff]  ;;  %s1366_s4 = smov 96  }
 0xe51   :  { %v939_v17 = vpop.permute.xlu0 %938 }
 0xe52   :  { %v941_v14 = vmul.f32 %v1328_v16, %v939_v17 }
 0xe54   :  { %943 = vrot.lane.b32.xlu1 %v941_v14, %s1348_s3 }
 0xec6   :  { %v944_v7 = vpop.permute.xlu1 %943 }
 0xec7   :  { %v1760_v51 = vadd.f32 %v944_v7, %v936_v26 }
 0xec9   :  { %1329 = vtanh.f32 %v1760_v51 }
 0xed6   :  { %v1330_v9 = vpop.eup %1329 }
 0xed7   :  { %949 = vrot.lane.b32.xlu0 %v1330_v9, %s1348_s3 }
 0xf49   :  { %v950_v50 = vpop.permute.xlu0 %949 }
 0xf4a   :  { %v952_v53 = vmul.f32 %v1328_v16, %v950_v50 }
 0xf4c   :  { %960 = vperm.xlu0 %1259, %v952_v53   ;;  %955 = vperm.xlu1 %1258, %v952_v53  }
 0xf50   :  { %1262 = vset.pattern.permute.xlu0 %v1879_v21  ;;  %1260 = vset.pattern.permute.xlu1 %v1880_v48 }
 0xf51   :  { %975 = vperm.xlu0 %1262, %v952_v53   ;;  %965 = vperm.xlu1 %1260, %v952_v53  }
 0xf55   :  { %1265 = vset.pattern.permute.xlu0 %v1873_v18  ;;  %1261 = vset.pattern.permute.xlu1 %v1874_v5 }
 0xf56   :  { %990 = vperm.xlu0 %1265, %v952_v53   ;;  %970 = vperm.xlu1 %1261, %v952_v53  }
 0xf5a   :  { %1268 = vset.pattern.permute.xlu0 %v1875_v59  ;;  %1263 = vset.pattern.permute.xlu1 %v1876_v60 }
 0xf5b   :  { %1005 = vperm.xlu0 %1268, %v952_v53   ;;  %980 = vperm.xlu1 %1263, %v952_v53  }
 0xf5f   :  { %1271 = vset.pattern.permute.xlu0 %v1866_v62  ;;  %1264 = vset.pattern.permute.xlu1 %v1867_v43 }
 0xf60   :  { %1020 = vperm.xlu0 %1271, %v952_v53   ;;  %985 = vperm.xlu1 %1264, %v952_v53  }
 0xf64   :  { %1266 = vset.pattern.permute.xlu1 %v1868_v13  ;;  %1274 = vset.pattern.permute.xlu0 %v1864_v25 }
 0xf65   :  { %995 = vperm.xlu1 %1266, %v952_v53  }
 0xf69   :  { %1267 = vset.pattern.permute.xlu1 %v1870_v61 }
 0xf6a   :  { %1000 = vperm.xlu1 %1267, %v952_v53  }
 0xf6e   :  { %1269 = vset.pattern.permute.xlu1 %v1861_v38 }
 0xf6f   :  { %1010 = vperm.xlu1 %1269, %v952_v53  }
 0xf73   :  { %1270 = vset.pattern.permute.xlu1 %v1862_v23 }
 0xf74   :  { %1015 = vperm.xlu1 %1270, %v952_v53  }
 0xf78   :  { %1272 = vset.pattern.permute.xlu1 %v1863_v20 }
 0xf79   :  { %1025 = vperm.xlu1 %1272, %v952_v53  }
 0xf7d   :  { %1273 = vset.pattern.permute.xlu1 %v1864_v25 }
 0xf7e   :  { %1030 = vperm.xlu1 %1273, %v952_v53   ;;  %v11_v53 = vstv %s1814_s5 }
 0xf7f   :  { %12 = vst [vmem:[#allocation2] sm:$0x1] %v11_v53 }
 0xfc7   :  { %v956_v62 = vpop.permute.xlu1 %955  ;;  %v961_v59 = vpop.permute.xlu0 %960 }
 0xfc8   :  { %v963_v19 = vmul.f32 %v961_v59, %v1508_v35  ;;  %v958_v11 = vmul.f32 %v956_v62, %v1882_v46  ;;  %v1128_v59 = vld [vmem:[#allocation2] ss:$0 sm:$0xff] }
 0xfcc   :  { %v966_v43 = vpop.permute.xlu1 %965  ;;  %v976_v60 = vpop.permute.xlu0 %975 }
 0xfcd   :  { %v978_v40 = vmul.f32 %v976_v60, %v1510_v36  ;;  %v968_v63 = vmul.f32 %v966_v43, %v1883_v34  ;;  %v1034_v34 = vadd.f32 %v963_v19, %v958_v11 }
 0xfd1   :  { %v971_v13 = vpop.permute.xlu1 %970  ;;  %v991_v38 = vpop.permute.xlu0 %990 }
 0xfd2   :  { %v973_v45 = vmul.f32 %v971_v13, %v1492_v29  ;;  %v993_v0 = vmul.f32 %v991_v38, %v1881_v57 }
 0xfd4   :  { %v1035_v31 = vadd.f32 %v973_v45, %v968_v63 }
 0xfd6   :  { %v981_v18 = vpop.permute.xlu1 %980  ;;  %v1006_v23 = vpop.permute.xlu0 %1005 }
 0xfd7   :  { %v983_v25 = vmul.f32 %v981_v18, %v1494_v30 }
 0xfd9   :  { %v1036_v57 = vadd.f32 %v983_v25, %v978_v40 }
 0xfdb   :  { %v986_v5 = vpop.permute.xlu1 %985  ;;  %v1021_v55 = vpop.permute.xlu0 %1020 }
 0xfdc   :  { %v988_v56 = vmul.f32 %v986_v5, %v1499_v6  ;;  %v1008_v6 = vmul.f32 %v1006_v23, %v1502_v33  ;;  %v1023_v12 = vmul.f32 %v1021_v55, %v1519_v42 }
 0xfde   :  { %v1037_v2 = vadd.f32 %v993_v0, %v988_v56 }
 0xfe0   :  { %v996_v61 = vpop.permute.xlu1 %995  ;;  %v1043_v3 = vadd.f32 %v1037_v2, %v1036_v57 }
 0xfe1   :  { %v998_v35 = vmul.f32 %v996_v61, %v1513_v37 }
 0xfe5   :  { %v1001_v21 = vpop.permute.xlu1 %1000 }
 0xfe6   :  { %v1003_v29 = vmul.f32 %v1001_v21, %v1516_v41  ;;  %v1042_v41 = vadd.f32 %v1035_v31, %v1034_v34 }
 0xfe8   :  { %v1038_v33 = vadd.f32 %v1003_v29, %v998_v35  ;;  %v1046_v10 = vadd.f32 %v1043_v3, %v1042_v41 }
 0xfea   :  { %v1011_v48 = vpop.permute.xlu1 %1010 }
 0xfeb   :  { %v1013_v54 = vmul.f32 %v1011_v48, %v1497_v32 }
 0xfed   :  { %v1039_v24 = vadd.f32 %v1013_v54, %v1008_v6 }
 0xfef   :  { %v1016_v39 = vpop.permute.xlu1 %1015  ;;  %v1044_v15 = vadd.f32 %v1039_v24, %v1038_v33 }
 0xff0   :  { %v1018_v30 = vmul.f32 %v1016_v39, %v1524_v4 }
 0xff2   :  { %v1040_v27 = vadd.f32 %v1023_v12, %v1018_v30 }
 0xff4   :  { %v1026_v20 = vpop.permute.xlu1 %1025 }
 0xff5   :  { %v1028_v46 = vmul.f32 %v1026_v20, %v1530_v1 }
 0xff9   :  { %v1031_v32 = vpop.permute.xlu1 %1030 }
 0xffa   :  { %v1033_v36 = vmul.f32 %v1031_v32, %v1527_v8 }
 0xffc   :  { %v1041_v58 = vadd.f32 %v1033_v36, %v1028_v46 }
 0xffe   :  { %v1045_v4 = vadd.f32 %v1041_v58, %v1040_v27 }
0x1000   :  { %v1047_v47 = vadd.f32 %v1045_v4, %v1044_v15 }
0x1002   :  { %v1048_v44 = vadd.f32 %v1047_v47, %v1046_v10 }
0x1004   :  { %v1050_v42 = vrot.slane %v1048_v44, 6 }
0x1006   :  { %v1052_v28 = vadd.f32 %v1050_v42, %v1674_v22  ;;  %v1061_v22 = vrot.slane %v1760_v51, 6 }
0x1008   :  { %1331 = vtanh.f32 %v1052_v28  ;;  %v1126_v1 = vmul.f32 -1.442695, %v1052_v28 }
0x100a   :  { %1333 = vpow2.f32 %v1126_v1 }
0x1015   :  { %v1332_v37 = vpop.eup %1331 }
0x1016   :  { %1065 = vrot.lane.b32.xlu0 %v1332_v37, %s1347_s26 }
0x1017   :  { %v1334_v8 = vpop.eup %1333 }
0x1018   :  { %v1056_v52 = vadd.f32 1.0, %v1334_v8 }
0x101a   :  { %1335 = vrcp.f32 %v1056_v52 }
0x1027   :  { %v1336_v16 = vpop.eup %1335 }
0x1028   :  { %v1063_v26 = vmul.f32 %v1336_v16, %v1061_v22 }
0x1088   :  { %v1066_v17 = vpop.permute.xlu0 %1065 }
0x1089   :  { %v1068_v14 = vmul.f32 %v1336_v16, %v1066_v17 }
0x108b   :  { %1070 = vrot.lane.b32.xlu1 %v1068_v14, %s1348_s3 }
0x108f   :  { %1086 = vrot.lane.b32.xlu1 %v1127_v49, %s1365_s9 }
0x10fd   :  { %v1071_v7 = vpop.permute.xlu1 %1070 }
0x10fe   :  { %v1073_v9 = vadd.f32 %v1071_v7, %v1063_v26 }
0x1100   :  { %1337 = vtanh.f32 %v1073_v9 }
0x1101   :  { %v1087_v43 = vpop.permute.xlu1 %1086 }
0x110d   :  { %v1338_v50 = vpop.eup %1337 }
0x110e   :  { %1076 = vrot.lane.b32.xlu0 %v1338_v50, %s1348_s3 }
0x1180   :  { %v1077_v62 = vpop.permute.xlu0 %1076 }
0x1181   :  { %v1079_v13 = vmul.f32 %v1336_v16, %v1077_v62 }
0x1183   :  { %v1089_v18 = vmul.f32 %v1087_v43, %v1079_v13 }
0x1185   :  { %1091 = vrot.lane.b32.xlu0 %v1089_v18, %s1366_s4 }
0x11f7   :  { %v1092_v51 = vpop.permute.xlu0 %1091 }
0x11f8   :  { %v1095_v5 = vsel %vm1094_vm0, %v1092_v51, 0.0 }
0x11f9   :  { %1096 = vadd.xlane.f32.xlu1 %v1095_v5 }
0x1282   :  { %v1097_v61 = vpop.xlane.xlu1 %1096 }
0x1283   :  { %v1105_v60 = vadd.f32 %v1128_v59, %v1097_v61 }
0x1285   :  { %v1129_v21 = vmul.f32 -1.442695, %v1105_v60 }
0x1287   :  { %1339 = vpow2.f32 %v1129_v21 }
0x1294   :  { %v1340_v38 = vpop.eup %1339 }
0x1295   :  { %v1109_v48 = vadd.f32 1.0, %v1340_v38 }
0x1297   :  { %1341 = vrcp.f32 %v1109_v48 }
0x12a4   :  { %v1342_v39 = vpop.eup %1341 }
0x12a5   :  { %1113 = vst.msk [vmem:[%s1815_s6 - $0x6] sm:$0xc0] %vm1112_vm1, %v1342_v39 }

</bundles_post_ra>
